<compile_context>
chip_gen: v6e
topology: v6e:2x2x1
jax: 0.10.0
libtpu: 0.0.40
codegen_flags: <defaults>
</compile_context>

<pallas_src>
import functools
import math

import jax
import jax.numpy as jnp
from jax.experimental import pallas as pl
from jax.experimental.pallas import tpu as pltpu

EPS = 1e-5


def _round_up(x, m):
    return ((x + m - 1) // m) * m


@functools.lru_cache(maxsize=None)
def _multi_tensorcore():
    """True on chips exposing >1 TensorCore per device (megacore / v7x-style)."""
    try:
        kind = jax.devices()[0].device_kind.lower()
    except Exception:
        return False
    return ("v7" in kind) or ("v4" in kind) or ("v5p" in kind)


def _choose_tm(m):
    """Row tile: single grid step on single-TC chips; split 2-way on multi-TC
    chips only when each half is >= 256 rows of work."""
    m8 = _round_up(max(m, 8), 8)
    if _multi_tensorcore() and m8 >= 512:
        return _round_up((m8 + 1) // 2, 8) if m8 <= 2048 else 512
    return m8 if m8 <= 1024 else 512


# ----------------------------------------------------------------------------
# Pallas kernels: fused (A @ W) + bias (+ReLU) [+ residual add + ReLU].
# A / W / residual are bf16; accumulate + epilogue in f32; output dtype is the
# caller's choice (bf16 when the result feeds another GEMM, f32 at the end).
# ----------------------------------------------------------------------------
def _mm_bias_kernel(a_ref, w_ref, b_ref, o_ref, *, relu):
    acc = jnp.dot(a_ref[...], w_ref[...], preferred_element_type=jnp.float32)
    acc = acc + b_ref[...]
    if relu:
        acc = jnp.maximum(acc, 0.0)
    o_ref[...] = acc.astype(o_ref.dtype)


def _mm_bias_res_kernel(a_ref, w_ref, b_ref, r_ref, o_ref, *, relu):
    acc = jnp.dot(a_ref[...], w_ref[...], preferred_element_type=jnp.float32)
    acc = acc + b_ref[...]
    if relu:                                   # conv + BN + ReLU
        acc = jnp.maximum(acc, 0.0)
    # fused closing residual: relu(x + skip + refine(ctx))
    acc = jnp.maximum(acc + r_ref[...].astype(jnp.float32), 0.0)
    o_ref[...] = acc.astype(o_ref.dtype)


def pallas_matmul_bias(a, w_p, b_p, *, relu=False, residual=None, n_real=None,
                       out_dtype=jnp.float32):
    """(M,K) @ pre-padded bf16 weight (Kw,Np) + f32 bias row.

    K is NOT padded to 128: A keeps its true contraction width (MXU masks the
    short contraction internally at zero HBM cost).  Optional fused residual
    add + ReLU epilogue, optional bf16 output.
    """
    M, K = a.shape
    Kw, Np = w_p.shape
    if n_real is None:
        n_real = Np

    a = a.astype(jnp.bfloat16)
    if K != Kw:                       # only if K was not already 8-aligned
        a = jnp.pad(a, ((0, 0), (0, Kw - K)))
    TM = _choose_tm(M)
    Mp = _round_up(M, TM)
    if Mp != M:
        a = jnp.pad(a, ((0, Mp - M), (0, 0)))

    in_specs = [
        pl.BlockSpec((TM, Kw), lambda i: (i, 0)),
        pl.BlockSpec((Kw, Np), lambda i: (0, 0)),
        pl.BlockSpec((1, Np), lambda i: (0, 0)),
    ]
    args = [a, w_p, b_p]
    if residual is not None:
        r = residual.astype(jnp.bfloat16)
        rM, rN = r.shape
        r = jnp.pad(r, ((0, Mp - rM), (0, Np - rN)))
        in_specs.append(pl.BlockSpec((TM, Np), lambda i: (i, 0)))
        args.append(r)
        kernel = functools.partial(_mm_bias_res_kernel, relu=relu)
    else:
        kernel = functools.partial(_mm_bias_kernel, relu=relu)

    out_bytes = jnp.dtype(out_dtype).itemsize
    res_block = (TM * Np * 2) if residual is not None else 0
    # double-buffered A/out/residual blocks + resident (but conservatively 2x)
    # weight and bias
    vmem_blocks = (2 * (TM * Kw * 2 + TM * Np * out_bytes + res_block)
                   + 2 * (Kw * Np * 2 + Np * 4))
    vmem_limit = int(min(max(3 * vmem_blocks + 4 * 1024 * 1024,
                             8 * 1024 * 1024),
                         64 * 1024 * 1024))      # <= v7x physical VMEM

    bytes_accessed = (M * K * 2 + Kw * Np * 2 + Np * 4 + Mp * Np * out_bytes
                      + (Mp * Np * 2 if residual is not None else 0))
    cost = pl.CostEstimate(flops=2 * M * Kw * n_real, transcendentals=0,
                           bytes_accessed=bytes_accessed)

    out = pl.pallas_call(
        kernel,
        out_shape=jax.ShapeDtypeStruct((Mp, Np), out_dtype),
        grid=(Mp // TM,),
        in_specs=in_specs,
        out_specs=pl.BlockSpec((TM, Np), lambda i: (i, 0)),
        compiler_params=pltpu.CompilerParams(
            dimension_semantics=("parallel",),
            vmem_limit_bytes=vmem_limit,
        ),
        cost_estimate=cost,
    )(*args)
    return out[:M, :n_real]


# ----------------------------------------------------------------------------
# Parameter prep: fold BN scale into weights, pre-pad N to 128, cast bf16.
# ----------------------------------------------------------------------------
def _pad_gemm_params(wmat, bias):
    K, O = wmat.shape
    Kp = _round_up(K, 8)        # sublane alignment only; MXU pads K internally
    Np = _round_up(O, 128)      # lane-dense output columns, no 256-wide slabs
    w_p = jnp.pad(wmat, ((0, Kp - K), (0, Np - O))).astype(jnp.bfloat16)
    b_p = jnp.pad(bias.reshape(1, O).astype(jnp.float32), ((0, 0), (0, Np - O)))
    return w_p, b_p, O


def prep_conv_bn(w, scale, bias):
    """PyTorch Conv2d weight (O,C,kh,kw) + folded BN -> padded GEMM operands."""
    O, C, kh, kw = w.shape
    wmat = (w * scale[:, None, None, None]).transpose(2, 3, 1, 0)
    wmat = wmat.reshape(kh * kw * C, O)
    return _pad_gemm_params(wmat, bias)


# phase parity -> ((input row/col offset, transposed-conv kernel tap), ...)
_UP_TAPS = {0: ((0, 1), (-1, 3)), 1: ((1, 0), (0, 2))}


def prep_convtranspose4x4_bn(wt, scale, bias):
    """ConvTranspose2d(k=4, s=2, p=1) weight (Cin,Cout,4,4) -> 4-phase GEMM.

    Each output-pixel parity (py, px) is a 2x2 conv over the input; all four
    phases share one 3x3 im2col and are evaluated as a single GEMM with
    4*Cout output columns (no zero-stuffed intermediate, no wasted MACs).
    """
    cin, cout = wt.shape[0], wt.shape[1]
    wp = jnp.zeros((3, 3, cin, 2, 2, cout), jnp.float32)
    for py in (0, 1):
        for px in (0, 1):
            for dy, ky in _UP_TAPS[py]:
                for dx, kx in _UP_TAPS[px]:
                    wp = wp.at[dy + 1, dx + 1, :, py, px, :].add(wt[:, :, ky, kx])
    wp = wp * scale[None, None, None, None, None, :]
    wmat = wp.reshape(9 * cin, 4 * cout)
    return _pad_gemm_params(wmat, jnp.tile(bias, 4))


# ----------------------------------------------------------------------------
# Conv wrappers (NHWC im2col glue -> Pallas GEMM)
# ----------------------------------------------------------------------------
def _im2col_nhwc(x, kh, kw, padding):
    x = x.astype(jnp.bfloat16)        # build the 9x-expanded patch buffer in bf16
    n, h, w, c = x.shape
    xp = jnp.pad(x, ((0, 0), (padding, padding), (padding, padding), (0, 0)))
    ho = h + 2 * padding - kh + 1
    wo = w + 2 * padding - kw + 1
    cols = [xp[:, i:i + ho, j:j + wo, :] for i in range(kh) for j in range(kw)]
    patches = jnp.concatenate(cols, axis=-1)             # (n, ho, wo, kh*kw*c)
    return patches.reshape(n * ho * wo, kh * kw * c), (n, ho, wo)


def conv1x1_bn(x, prep, *, relu=False, out_dtype=jnp.bfloat16):
    n, h, w, c = x.shape
    w_p, b_p, o = prep
    out = pallas_matmul_bias(x.reshape(n * h * w, c), w_p, b_p, relu=relu,
                             n_real=o, out_dtype=out_dtype)
    return out.reshape(n, h, w, o)


def conv3x3_bn_residual(x, prep, residual):
    """3x3 conv + BN + ReLU with the closing relu(residual + .) fused in."""
    w_p, b_p, o = prep
    a, (n, ho, wo) = _im2col_nhwc(x, 3, 3, padding=1)
    r = residual.reshape(n * ho * wo, residual.shape[-1])
    out = pallas_matmul_bias(a, w_p, b_p, relu=True, residual=r, n_real=o,
                             out_dtype=jnp.float32)
    return out.reshape(n, ho, wo, o)


def conv_transpose2x_bn(x, prep):
    """ConvTranspose2d(k=4,s=2,p=1)+BN via 4-phase decomposition (one GEMM)."""
    w_p, b_p, o4 = prep
    cout = o4 // 4
    a, (n, h, w) = _im2col_nhwc(x, 3, 3, padding=1)
    out = pallas_matmul_bias(a, w_p, b_p, relu=False, n_real=o4,
                             out_dtype=jnp.bfloat16)
    out = out.reshape(n, h, w, 2, 2, cout)
    out = out.transpose(0, 1, 3, 2, 4, 5).reshape(n, 2 * h, 2 * w, cout)
    return out


# ----------------------------------------------------------------------------
# Misc glue
# ----------------------------------------------------------------------------
def layer_norm_hw(x, eps=1e-5):
    """F.layer_norm over the (H, W) dims of an NHWC (n, h, w, 1) map."""
    mean = jnp.mean(x, axis=(1, 2), keepdims=True)
    var = jnp.mean((x - mean) ** 2, axis=(1, 2), keepdims=True)
    return (x - mean) * jax.lax.rsqrt(var + eps)


# ----------------------------------------------------------------------------
# QCModule forward (NHWC internally)
# ----------------------------------------------------------------------------
def qc_get_context(params, q, v):
    n, h, w, c = q.shape
    hw = h * w
    # keep the softmax / context / layer-norm math in f32 (inputs arrive bf16)
    qf = q.reshape(n, hw, c).astype(jnp.float32)
    vf = v.astype(jnp.float32)

    # TODO(synk): conv_mask (single output channel), the per-batch (c,)
    # context matmuls and context_conv (1x1 spatial, M = batch) stay in plain
    # JAX: their padded MXU tiles would be >98% padding, so a Pallas launch is
    # pure overhead.
    vm = jnp.einsum("nhwc,c->nhw", vf, params["mask"]).reshape(n, hw)
    vm = jax.nn.softmax(vm, axis=-1)
    context = jnp.einsum("nkc,nk->nc", qf, vm)                # (n, c)

    w1, b1 = params["ctx1"]
    w2, b2 = params["ctx2"]
    context1 = context @ w1 + b1
    context1 = jnp.maximum(context1 @ w2 + b2, 0.0)           # (n, c)
    context1 = context1[:, None, None, :]                     # (n, 1, 1, c)

    context_bak = jax.nn.softmax(context, axis=-1)            # softmax over c
    qs = jax.nn.softmax(qf, axis=-1)                          # softmax over c
    ct = jnp.einsum("nc,nkc->nk", context_bak, qs).reshape(n, h, w, 1)
    ct = layer_norm_hw(ct)

    return jnp.maximum(context1 + ct, 0.0)                    # (n, h, w, c) f32


def qc_forward(params, x, skip, scale_factor=2):
    """QCModule.forward.  x, skip given NCHW (PyTorch layout); returns NCHW."""
    x = jnp.transpose(x, (0, 2, 3, 1))       # NHWC: channels on the lane dim
    skip = jnp.transpose(skip, (0, 2, 3, 1))
    if scale_factor != 1:
        x = conv_transpose2x_bn(x, params["up"])              # bf16
    skip = conv1x1_bn(skip, params["skip"])                    # bf16
    ctx = qc_get_context(params, x, skip)                      # f32
    resid = (x + skip).astype(jnp.bfloat16)                    # fed to epilogue
    # refine (3x3 conv + BN + ReLU) with relu(x + skip + .) fused in-kernel
    out = conv3x3_bn_residual(ctx, params["refine"], resid)    # f32
    return jnp.transpose(out, (0, 3, 1, 2))


# ----------------------------------------------------------------------------
# Deterministic parameter init (inference-mode BN folded to scale/bias)
# ----------------------------------------------------------------------------
class KeyGen:
    def __init__(self, key):
        self.key = key

    def __call__(self):
        self.key, sub = jax.random.split(self.key)
        return sub


def init_conv(kg, cout, cin, k):
    fan_in = cin * k * k
    return jax.random.normal(kg(), (cout, cin, k, k), jnp.float32) / math.sqrt(fan_in)


def init_bn(kg, c):
    gamma = 1.0 + 0.1 * jax.random.normal(kg(), (c,), jnp.float32)
    beta = 0.1 * jax.random.normal(kg(), (c,), jnp.float32)
    mean = 0.1 * jax.random.normal(kg(), (c,), jnp.float32)
    var = jnp.abs(jax.random.normal(kg(), (c,), jnp.float32)) + 0.5
    scale = gamma / jnp.sqrt(var + EPS)
    bias = beta - mean * scale
    return scale, bias


def init_qc_params(key, skip_channels, out_channels):
    kg = KeyGen(key)
    oc = out_channels
    p = {}
    # skip_conv: 1x1 conv + BN
    p["skip"] = prep_conv_bn(init_conv(kg, oc, skip_channels, 1), *init_bn(kg, oc))
    # up_conv: ConvTranspose2d(4, s=2, p=1) + BN  (PyTorch layout (Cin,Cout,4,4))
    wt = jax.random.normal(kg(), (oc, oc, 4, 4), jnp.float32) / math.sqrt(oc * 16)
    p["up"] = prep_convtranspose4x4_bn(wt, *init_bn(kg, oc))
    # conv_mask: 1x1, 1 output channel, no BN / bias
    p["mask"] = init_conv(kg, 1, oc, 1).reshape(oc)
    # context_conv: two 1x1 convs (+BN); folded to dense (Cin, Cout) f32 mats
    w1 = init_conv(kg, 2 * oc, oc, 1).reshape(2 * oc, oc)
    s1, b1 = init_bn(kg, 2 * oc)
    p["ctx1"] = (w1.T * s1[None, :], b1)
    w2 = init_conv(kg, oc, 2 * oc, 1).reshape(oc, 2 * oc)
    s2, b2 = init_bn(kg, oc)
    p["ctx2"] = (w2.T * s2[None, :], b2)
    # refine: 3x3 conv + BN + ReLU
    p["refine"] = prep_conv_bn(init_conv(kg, oc, oc, 3), *init_bn(kg, oc))
    return p


# ----------------------------------------------------------------------------
if __name__ == "__main__":
    root = jax.random.PRNGKey(0)
    pkey, dkey = jax.random.split(root)

    skip_channels = 24
    out_channels = 16
    batch = 2
    h = w = 8  # x spatial; skip is 2x (matches the ConvTranspose upsample)

    params = init_qc_params(pkey, skip_channels, out_channels)

    kx, ks = jax.random.split(dkey)
    x = jax.random.normal(kx, (batch, out_channels, h, w), jnp.float32)
    skip = jax.random.normal(ks, (batch, skip_channels, 2 * h, 2 * w), jnp.float32)

    # Close over params so the pre-padded bf16 weights (and Python-int channel
    # counts) are trace-time constants.
    fwd = jax.jit(lambda a, b: qc_forward(params, a, b, scale_factor=2))
    out = fwd(x, skip)
    jax.block_until_ready(out)

    assert out.shape == (batch, out_channels, 2 * h, 2 * w), out.shape
    assert bool(jnp.all(jnp.isfinite(out)))
    print("KERNEL_OK")
</pallas_src>

<mosaic_0001>
module attributes {stable_mosaic.version = 11 : i64} {
  func.func @_mm_bias_kernel(%arg0: i32, %arg1: memref<512x24xbf16, #tpu.memory_space<vmem>>, %arg2: memref<24x128xbf16, #tpu.memory_space<vmem>>, %arg3: memref<1x128xf32, #tpu.memory_space<vmem>>, %arg4: memref<512x128xbf16, #tpu.memory_space<vmem>>) attributes {dimension_semantics = [#tpu.dimension_semantics<parallel>], iteration_bounds = array<i64: 1>, scalar_prefetch = 0 : i64, scratch_operands = 0 : i64, tpu.core_type = #tpu.core_type<tc>, window_params = [{transform_indices = @transform_0, window_bounds = array<i64: 512, 24>}, {pipeline_mode = #tpu.pipeline_mode<synchronous>, transform_indices = @transform_1, window_bounds = array<i64: 24, 128>}, {pipeline_mode = #tpu.pipeline_mode<synchronous>, transform_indices = @transform_2, window_bounds = array<i64: 1, 128>}, {transform_indices = @transform_3, window_bounds = array<i64: 512, 128>}]} {
    %c0 = arith.constant 0 : index
    %c0_0 = arith.constant 0 : index
    %0 = vector.load %arg1[%c0, %c0_0] : memref<512x24xbf16, #tpu.memory_space<vmem>>, vector<512x24xbf16>
    %c0_1 = arith.constant 0 : index
    %c0_2 = arith.constant 0 : index
    %1 = vector.load %arg2[%c0_1, %c0_2] : memref<24x128xbf16, #tpu.memory_space<vmem>>, vector<24x128xbf16>
    %cst = arith.constant dense<0.000000e+00> : vector<512x128xf32>
    %2 = tpu.matmul %0, %1, %cst {dimension_numbers = #tpu.dot_dimension_numbers<[1], [0], [0], [1], [0, 0, 1, 1], [], []>} : vector<512x24xbf16>, vector<24x128xbf16>, vector<512x128xf32> -> vector<512x128xf32>
    %c0_3 = arith.constant 0 : index
    %c0_4 = arith.constant 0 : index
    %3 = vector.load %arg3[%c0_3, %c0_4] : memref<1x128xf32, #tpu.memory_space<vmem>>, vector<1x128xf32>
    %4 = vector.broadcast %3 : vector<1x128xf32> to vector<512x128xf32>
    %5 = arith.addf %2, %4 : vector<512x128xf32>
    %6 = arith.truncf %5 : vector<512x128xf32> to vector<512x128xbf16>
    %c0_5 = arith.constant 0 : index
    %c0_6 = arith.constant 0 : index
    %7 = vector.load %arg4[%c0_5, %c0_6] : memref<512x128xbf16, #tpu.memory_space<vmem>>, vector<512x128xbf16>
    tpu.vector_store %arg4[%c0_5, %c0_6], %6 {strides = array<i32>} : memref<512x128xbf16, #tpu.memory_space<vmem>>, vector<512x128xbf16>,
    return
  }
  func.func @transform_0(%arg0: i32) -> (i32, i32) {
    %c0_i32 = arith.constant 0 : i32
    %c0_i32_0 = arith.constant 0 : i32
    return %arg0, %c0_i32 : i32, i32
  }
  func.func @transform_1(%arg0: i32) -> (i32, i32) {
    %c0_i32 = arith.constant 0 : i32
    %c0_i32_0 = arith.constant 0 : i32
    %c0_i32_1 = arith.constant 0 : i32
    return %c0_i32, %c0_i32_0 : i32, i32
  }
  func.func @transform_2(%arg0: i32) -> (i32, i32) {
    %c0_i32 = arith.constant 0 : i32
    %c0_i32_0 = arith.constant 0 : i32
    %c0_i32_1 = arith.constant 0 : i32
    return %c0_i32, %c0_i32_0 : i32, i32
  }
  func.func @transform_3(%arg0: i32) -> (i32, i32) {
    %c0_i32 = arith.constant 0 : i32
    %c0_i32_0 = arith.constant 0 : i32
    return %arg0, %c0_i32 : i32, i32
  }
}

module attributes {stable_mosaic.version = 11 : i64} {
  func.func @_mm_bias_kernel(%arg0: i32, %arg1: memref<128x144xbf16, #tpu.memory_space<vmem>>, %arg2: memref<144x128xbf16, #tpu.memory_space<vmem>>, %arg3: memref<1x128xf32, #tpu.memory_space<vmem>>, %arg4: memref<128x128xbf16, #tpu.memory_space<vmem>>) attributes {dimension_semantics = [#tpu.dimension_semantics<parallel>], iteration_bounds = array<i64: 1>, scalar_prefetch = 0 : i64, scratch_operands = 0 : i64, tpu.core_type = #tpu.core_type<tc>, window_params = [{transform_indices = @transform_0, window_bounds = array<i64: 128, 144>}, {pipeline_mode = #tpu.pipeline_mode<synchronous>, transform_indices = @transform_1, window_bounds = array<i64: 144, 128>}, {pipeline_mode = #tpu.pipeline_mode<synchronous>, transform_indices = @transform_2, window_bounds = array<i64: 1, 128>}, {transform_indices = @transform_3, window_bounds = array<i64: 128, 128>}]} {
    %c0 = arith.constant 0 : index
    %c0_0 = arith.constant 0 : index
    %0 = vector.load %arg1[%c0, %c0_0] : memref<128x144xbf16, #tpu.memory_space<vmem>>, vector<128x144xbf16>
    %c0_1 = arith.constant 0 : index
    %c0_2 = arith.constant 0 : index
    %1 = vector.load %arg2[%c0_1, %c0_2] : memref<144x128xbf16, #tpu.memory_space<vmem>>, vector<144x128xbf16>
    %cst = arith.constant dense<0.000000e+00> : vector<128x128xf32>
    %2 = tpu.matmul %0, %1, %cst {dimension_numbers = #tpu.dot_dimension_numbers<[1], [0], [0], [1], [0, 0, 1, 1], [], []>} : vector<128x144xbf16>, vector<144x128xbf16>, vector<128x128xf32> -> vector<128x128xf32>
    %c0_3 = arith.constant 0 : index
    %c0_4 = arith.constant 0 : index
    %3 = vector.load %arg3[%c0_3, %c0_4] : memref<1x128xf32, #tpu.memory_space<vmem>>, vector<1x128xf32>
    %4 = vector.broadcast %3 : vector<1x128xf32> to vector<128x128xf32>
    %5 = arith.addf %2, %4 : vector<128x128xf32>
    %6 = arith.truncf %5 : vector<128x128xf32> to vector<128x128xbf16>
    %c0_5 = arith.constant 0 : index
    %c0_6 = arith.constant 0 : index
    %7 = vector.load %arg4[%c0_5, %c0_6] : memref<128x128xbf16, #tpu.memory_space<vmem>>, vector<128x128xbf16>
    tpu.vector_store %arg4[%c0_5, %c0_6], %6 {strides = array<i32>} : memref<128x128xbf16, #tpu.memory_space<vmem>>, vector<128x128xbf16>,
    return
  }
  func.func @transform_0(%arg0: i32) -> (i32, i32) {
    %c0_i32 = arith.constant 0 : i32
    %c0_i32_0 = arith.constant 0 : i32
    return %arg0, %c0_i32 : i32, i32
  }
  func.func @transform_1(%arg0: i32) -> (i32, i32) {
    %c0_i32 = arith.constant 0 : i32
    %c0_i32_0 = arith.constant 0 : i32
    %c0_i32_1 = arith.constant 0 : i32
    return %c0_i32, %c0_i32_0 : i32, i32
  }
  func.func @transform_2(%arg0: i32) -> (i32, i32) {
    %c0_i32 = arith.constant 0 : i32
    %c0_i32_0 = arith.constant 0 : i32
    %c0_i32_1 = arith.constant 0 : i32
    return %c0_i32, %c0_i32_0 : i32, i32
  }
  func.func @transform_3(%arg0: i32) -> (i32, i32) {
    %c0_i32 = arith.constant 0 : i32
    %c0_i32_0 = arith.constant 0 : i32
    return %arg0, %c0_i32 : i32, i32
  }
}

module attributes {stable_mosaic.version = 11 : i64} {
  func.func @_mm_bias_res_kernel(%arg0: i32, %arg1: memref<512x144xbf16, #tpu.memory_space<vmem>>, %arg2: memref<144x128xbf16, #tpu.memory_space<vmem>>, %arg3: memref<1x128xf32, #tpu.memory_space<vmem>>, %arg4: memref<512x128xbf16, #tpu.memory_space<vmem>>, %arg5: memref<512x128xf32, #tpu.memory_space<vmem>>) attributes {dimension_semantics = [#tpu.dimension_semantics<parallel>], iteration_bounds = array<i64: 1>, scalar_prefetch = 0 : i64, scratch_operands = 0 : i64, tpu.core_type = #tpu.core_type<tc>, window_params = [{transform_indices = @transform_0, window_bounds = array<i64: 512, 144>}, {pipeline_mode = #tpu.pipeline_mode<synchronous>, transform_indices = @transform_1, window_bounds = array<i64: 144, 128>}, {pipeline_mode = #tpu.pipeline_mode<synchronous>, transform_indices = @transform_2, window_bounds = array<i64: 1, 128>}, {transform_indices = @transform_3, window_bounds = array<i64: 512, 128>}, {transform_indices = @transform_4, window_bounds = array<i64: 512, 128>}]} {
    %c0 = arith.constant 0 : index
    %c0_0 = arith.constant 0 : index
    %0 = vector.load %arg1[%c0, %c0_0] : memref<512x144xbf16, #tpu.memory_space<vmem>>, vector<512x144xbf16>
    %c0_1 = arith.constant 0 : index
    %c0_2 = arith.constant 0 : index
    %1 = vector.load %arg2[%c0_1, %c0_2] : memref<144x128xbf16, #tpu.memory_space<vmem>>, vector<144x128xbf16>
    %cst = arith.constant dense<0.000000e+00> : vector<512x128xf32>
    %2 = tpu.matmul %0, %1, %cst {dimension_numbers = #tpu.dot_dimension_numbers<[1], [0], [0], [1], [0, 0, 1, 1], [], []>} : vector<512x144xbf16>, vector<144x128xbf16>, vector<512x128xf32> -> vector<512x128xf32>
    %c0_3 = arith.constant 0 : index
    %c0_4 = arith.constant 0 : index
    %3 = vector.load %arg3[%c0_3, %c0_4] : memref<1x128xf32, #tpu.memory_space<vmem>>, vector<1x128xf32>
    %4 = vector.broadcast %3 : vector<1x128xf32> to vector<512x128xf32>
    %5 = arith.addf %2, %4 : vector<512x128xf32>
    %cst_5 = arith.constant 0.000000e+00 : f32
    %6 = vector.broadcast %cst_5 : f32 to vector<512x128xf32>
    %7 = arith.maximumf %5, %6 : vector<512x128xf32>
    %c0_6 = arith.constant 0 : index
    %c0_7 = arith.constant 0 : index
    %8 = vector.load %arg4[%c0_6, %c0_7] : memref<512x128xbf16, #tpu.memory_space<vmem>>, vector<512x128xbf16>
    %9 = arith.extf %8 : vector<512x128xbf16> to vector<512x128xf32>
    %10 = arith.addf %7, %9 : vector<512x128xf32>
    %cst_8 = arith.constant 0.000000e+00 : f32
    %11 = vector.broadcast %cst_8 : f32 to vector<512x128xf32>
    %12 = arith.maximumf %10, %11 : vector<512x128xf32>
    %c0_9 = arith.constant 0 : index
    %c0_10 = arith.constant 0 : index
    %13 = vector.load %arg5[%c0_9, %c0_10] : memref<512x128xf32, #tpu.memory_space<vmem>>, vector<512x128xf32>
    tpu.vector_store %arg5[%c0_9, %c0_10], %12 {strides = array<i32>} : memref<512x128xf32, #tpu.memory_space<vmem>>, vector<512x128xf32>,
    return
  }
  func.func @transform_0(%arg0: i32) -> (i32, i32) {
    %c0_i32 = arith.constant 0 : i32
    %c0_i32_0 = arith.constant 0 : i32
    return %arg0, %c0_i32 : i32, i32
  }
  func.func @transform_1(%arg0: i32) -> (i32, i32) {
    %c0_i32 = arith.constant 0 : i32
    %c0_i32_0 = arith.constant 0 : i32
    %c0_i32_1 = arith.constant 0 : i32
    return %c0_i32, %c0_i32_0 : i32, i32
  }
  func.func @transform_2(%arg0: i32) -> (i32, i32) {
    %c0_i32 = arith.constant 0 : i32
    %c0_i32_0 = arith.constant 0 : i32
    %c0_i32_1 = arith.constant 0 : i32
    return %c0_i32, %c0_i32_0 : i32, i32
  }
  func.func @transform_3(%arg0: i32) -> (i32, i32) {
    %c0_i32 = arith.constant 0 : i32
    %c0_i32_0 = arith.constant 0 : i32
    return %arg0, %c0_i32 : i32, i32
  }
  func.func @transform_4(%arg0: i32) -> (i32, i32) {
    %c0_i32 = arith.constant 0 : i32
    %c0_i32_0 = arith.constant 0 : i32
    return %arg0, %c0_i32 : i32, i32
  }
}

</mosaic_0001>

<bundles_post_ra>
// kernel: _lambda_.3
= control target key start
LH: loop header
LB: loop body
LE: loop exit
PB: predicated region body
PF: predicated region fallthrough
CT: control target
= control target key end

     0   :  { %v553_v0 = vmov 0   ;;  %vm182_vm0 = vcmask 130048   ;;  %s684_s1 = inlined_call_operand.vmem [shape: bf16[144,128], index: 1, kind: input, shape index: {}]   ;;  %s685_s0 = inlined_call_operand.vmem [shape: bf16[128,144], index: 0, kind: input, shape index: {}]   ;;  %s686_s2 = inlined_call_operand.vmem [shape: f32[1,128], index: 2, kind: input, shape index: {}]   ;;  %s687_s3 = inlined_call_operand.vmem [shape: bf16[128,128], index: 3, kind: output, shape index: {}]  }
   0x1   :  { %207 = vmatprep.subr.bf16.mxu0 %v553_v0  ;;  %501 = vmatprep.subr.bf16.mxu1 %v553_v0  ;;  %v520_v1 = vld [vmem:[%s684_s1 + $0x38] sm:$0xff]   ;;  %v521_v2 = vld [vmem:[%s684_s1 + $0x30] sm:$0xff]   ;;  %v522_v3 = vld [vmem:[%s684_s1 + $0x28] sm:$0xff]  }
   0x2   :  { %208 = vmatpush1.bf16.msra.mxu0 %v520_v1  ;;  %510 = vmatpush1.bf16.msra.mxu1 %v520_v1  ;;  %v523_v4 = vld [vmem:[%s684_s1 + $0x20] sm:$0xff]   ;;  %v524_v7 = vld [vmem:[%s684_s1 + $0x18] sm:$0xff]   ;;  %v525_v8 = vld [vmem:[%s684_s1 + $0x10] sm:$0xff]  }
   0x3   :  { %209 = vmatprep.subr.bf16.mxu0 %v553_v0  ;;  %502 = vmatprep.subr.bf16.mxu1 %v553_v0  ;;  %v531_v5 = vld [vmem:[%s685_s0 + $0x4] ss:$8 sps:$4 sm:$0xff]   ;;  %v529_v12 = vld [vmem:[%s685_s0] ss:$8 sps:$4 sm:$0xff]   ;;  %v535_v14 = vld [vmem:[%s685_s0 + $0x14] ss:$8 sps:$4 sm:$0xff]  }
   0x4   :  { %v534_v6 = vld [vmem:[%s685_s0 + $0x44] ss:$8 sps:$4 sm:$0xff]   ;;  %414 = vmatprep.mubr.msk.bf16.mxu0 %vm182_vm0, %v531_v5  ;;  %v532_v13 = vld [vmem:[%s685_s0 + $0x40] ss:$8 sps:$4 sm:$0xff]   ;;  %v537_v15 = vld [vmem:[%s685_s0 + $0x54] ss:$8 sps:$4 sm:$0xff]  }
   0x5   :  { %418 = vmatprep.mubr.msk.bf16.mxu1 %vm182_vm0, %v534_v6  ;;  %v526_v9 = vld [vmem:[%s684_s1 + $0x8] sm:$0xff]   ;;  %v527_v10 = vld [vmem:[%s684_s1] sm:$0xff]   ;;  %v539_v16 = vld [vmem:[%s685_s0 + $0x10] ss:$8 sps:$4 sm:$0xff]  }
   0x6   :  { %210 = vmatpush1.bf16.msra.mxu0 %v521_v2  ;;  %511 = vmatpush1.bf16.msra.mxu1 %v521_v2  ;;  %v528_v11 = vld [vmem:[%s684_s1 + $0x40] sm:$0xff]   ;;  %v540_v17 = vld [vmem:[%s685_s0 + $0x50] ss:$8 sps:$4 sm:$0xff]   ;;  %v547_v22 = vld [vmem:[%s685_s0 + $0x34] ss:$8 sps:$4 sm:$0xff]  }
   0x7   :  { %211 = vmatprep.subr.bf16.mxu0 %v553_v0  ;;  %503 = vmatprep.subr.bf16.mxu1 %v553_v0  ;;  %v541_v18 = vld [vmem:[%s685_s0 + $0x24] ss:$8 sps:$4 sm:$0xff]   ;;  %v545_v20 = vld [vmem:[%s685_s0 + $0x20] ss:$8 sps:$4 sm:$0xff]   ;;  %v549_v23 = vld [vmem:[%s685_s0 + $0x74] ss:$8 sps:$4 sm:$0xff]  }
   0x8   :  { %v543_v19 = vld [vmem:[%s685_s0 + $0x64] ss:$8 sps:$4 sm:$0xff]   ;;  %v546_v21 = vld [vmem:[%s685_s0 + $0x60] ss:$8 sps:$4 sm:$0xff]   ;;  %v551_v24 = vld [vmem:[%s685_s0 + $0x30] ss:$8 sps:$4 sm:$0xff]  }
   0x9   :  { %v552_v25 = vld [vmem:[%s685_s0 + $0x70] ss:$8 sps:$4 sm:$0xff]   ;;  %v388_v28 = vld [vmem:[%s686_s2] ss:$0 sm:$0xff] }
   0xa   :  { %212 = vmatpush1.bf16.msra.mxu0 %v522_v3  ;;  %512 = vmatpush1.bf16.msra.mxu1 %v522_v3 }
   0xb   :  { %213 = vmatprep.subr.bf16.mxu0 %v553_v0  ;;  %504 = vmatprep.subr.bf16.mxu1 %v553_v0 }
   0xe   :  { %214 = vmatpush1.bf16.msra.mxu0 %v523_v4  ;;  %513 = vmatpush1.bf16.msra.mxu1 %v523_v4 }
   0xf   :  { %215 = vmatprep.subr.bf16.mxu0 %v553_v0  ;;  %505 = vmatprep.subr.bf16.mxu1 %v553_v0 }
  0x12   :  { %216 = vmatpush1.bf16.msra.mxu0 %v524_v7  ;;  %514 = vmatpush1.bf16.msra.mxu1 %v524_v7 }
  0x13   :  { %217 = vmatprep.subr.bf16.mxu0 %v553_v0  ;;  %506 = vmatprep.subr.bf16.mxu1 %v553_v0 }
  0x16   :  { %218 = vmatpush1.bf16.msra.mxu0 %v525_v8  ;;  %515 = vmatpush1.bf16.msra.mxu1 %v525_v8 }
  0x17   :  { %219 = vmatprep.subr.bf16.mxu0 %v553_v0  ;;  %507 = vmatprep.subr.bf16.mxu1 %v553_v0 }
  0x1a   :  { %220 = vmatpush1.bf16.msra.mxu0 %v526_v9  ;;  %516 = vmatpush1.bf16.msra.mxu1 %v526_v9 }
  0x1b   :  { %221 = vmatprep.subr.bf16.mxu0 %v553_v0  ;;  %508 = vmatprep.subr.bf16.mxu1 %v553_v0 }
  0x1e   :  { %222 = vmatpush1.bf16.msra.mxu0 %v527_v10  ;;  %517 = vmatpush1.bf16.msra.mxu1 %v527_v10 }
  0x1f   :  { %237 = vmatprep.subr.bf16.mxu0 %v553_v0  ;;  %509 = vmatprep.subr.bf16.mxu1 %v553_v0 }
  0x22   :  { %238 = vmatpush2.bf16.msra.mxu0 %v528_v11  ;;  %518 = vmatpush2.bf16.msra.mxu1 %v528_v11 }
  0x25   :  { %240 = vmatmul.mubr.bf16.vlgmr.msra.gmra.mxu0 %v529_v12  ;;  %272 = vmatmul.mubr.bf16.vlgmr.msra.gmra.mxu1 %v532_v13 }
  0x26   :  { %415 = vmatprep.mubr.msk.bf16.mxu0 %vm182_vm0, %v535_v14  ;;  %419 = vmatprep.mubr.msk.bf16.mxu1 %vm182_vm0, %v537_v15 }
  0x2d   :  { %248 = vmatmul.mubr.bf16.gmra.mxu0 %v539_v16  ;;  %280 = vmatmul.mubr.bf16.gmra.mxu1 %v540_v17 }
  0x2e   :  { %416 = vmatprep.mubr.msk.bf16.mxu0 %vm182_vm0, %v541_v18  ;;  %420 = vmatprep.mubr.msk.bf16.mxu1 %vm182_vm0, %v543_v19 }
  0x35   :  { %256 = vmatmul.mubr.bf16.gmra.mxu0 %v545_v20  ;;  %288 = vmatmul.mubr.bf16.gmra.mxu1 %v546_v21 }
  0x36   :  { %417 = vmatprep.mubr.msk.bf16.mxu0 %vm182_vm0, %v547_v22  ;;  %421 = vmatprep.mubr.msk.bf16.mxu1 %vm182_vm0, %v549_v23 }
  0x3d   :  { %264 = vmatmul.mubr.bf16.gmra.mxu0 %v551_v24  ;;  %296 = vmatmul.mubr.bf16.gmra.mxu1 %v552_v25 }
  0xe5   :  { %v241_v26 = vpop.f32.mrf.mxu0  ;;  %v273_v27 = vpop.f32.mrf.mxu1 }
  0xe6   :  { %v242_v33 = vadd.f32 %v388_v28, %v241_v26  ;;  %v274_v34 = vadd.f32 %v388_v28, %v273_v27 }
  0xe7   :  { %v243_v29 = vpop.f32.mrf.mxu0  ;;  %v275_v30 = vpop.f32.mrf.mxu1 }
  0xe9   :  { %v244_v31 = vpop.f32.mrf.mxu0  ;;  %v276_v32 = vpop.f32.mrf.mxu1 }
  0xea   :  { %v245_v35 = vadd.f32 %v388_v28, %v244_v31  ;;  %v277_v36 = vadd.f32 %v388_v28, %v276_v32 }
  0xeb   :  { %v246_v37 = vpop.f32.mrf.mxu0  ;;  %v278_v38 = vpop.f32.mrf.mxu1 }
  0xec   :  { %v457_v39 = vpack.c.bf16 %v245_v35, %v242_v33  ;;  %v477_v40 = vpack.c.bf16 %v277_v36, %v274_v34 }
  0xed   :  { %v249_v41 = vpop.f32.mrf.mxu0  ;;  %v281_v42 = vpop.f32.mrf.mxu1 }
  0xee   :  { %458 = vst [vmem:[%s687_s3] sm:$0xff] %v457_v39   ;;  %497 = vst [vmem:[%s687_s3 + $0x20] sm:$0xff] %v477_v40   ;;  %v250_v47 = vadd.f32 %v388_v28, %v249_v41  ;;  %v282_v48 = vadd.f32 %v388_v28, %v281_v42 }
  0xef   :  { %v251_v43 = vpop.f32.mrf.mxu0  ;;  %v283_v44 = vpop.f32.mrf.mxu1 }
  0xf1   :  { %v252_v45 = vpop.f32.mrf.mxu0  ;;  %v284_v46 = vpop.f32.mrf.mxu1 }
  0xf2   :  { %v253_v49 = vadd.f32 %v388_v28, %v252_v45  ;;  %v285_v50 = vadd.f32 %v388_v28, %v284_v46 }
  0xf3   :  { %v254_v51 = vpop.f32.mrf.mxu0  ;;  %v286_v52 = vpop.f32.mrf.mxu1 }
  0xf4   :  { %v462_v53 = vpack.c.bf16 %v253_v49, %v250_v47  ;;  %v482_v54 = vpack.c.bf16 %v285_v50, %v282_v48 }
  0xf5   :  { %v257_v55 = vpop.f32.mrf.mxu0  ;;  %v289_v56 = vpop.f32.mrf.mxu1 }
  0xf6   :  { %494 = vst [vmem:[%s687_s3 + $0x8] sm:$0xff] %v462_v53   ;;  %498 = vst [vmem:[%s687_s3 + $0x28] sm:$0xff] %v482_v54   ;;  %v258_v61 = vadd.f32 %v388_v28, %v257_v55  ;;  %v290_v62 = vadd.f32 %v388_v28, %v289_v56 }
  0xf7   :  { %v259_v57 = vpop.f32.mrf.mxu0  ;;  %v291_v58 = vpop.f32.mrf.mxu1 }
  0xf9   :  { %v260_v59 = vpop.f32.mrf.mxu0  ;;  %v292_v60 = vpop.f32.mrf.mxu1 }
  0xfa   :  { %v261_v63 = vadd.f32 %v388_v28, %v260_v59  ;;  %v293_v0 = vadd.f32 %v388_v28, %v292_v60 }
  0xfb   :  { %v262_v1 = vpop.f32.mrf.mxu0  ;;  %v294_v2 = vpop.f32.mrf.mxu1 }
  0xfc   :  { %v467_v3 = vpack.c.bf16 %v261_v63, %v258_v61  ;;  %v487_v4 = vpack.c.bf16 %v293_v0, %v290_v62 }
  0xfd   :  { %v265_v5 = vpop.f32.mrf.mxu0  ;;  %v297_v6 = vpop.f32.mrf.mxu1 }
  0xfe   :  { %495 = vst [vmem:[%s687_s3 + $0x10] sm:$0xff] %v467_v3   ;;  %499 = vst [vmem:[%s687_s3 + $0x30] sm:$0xff] %v487_v4   ;;  %v266_v11 = vadd.f32 %v388_v28, %v265_v5  ;;  %v298_v12 = vadd.f32 %v388_v28, %v297_v6 }
  0xff   :  { %v267_v7 = vpop.f32.mrf.mxu0  ;;  %v299_v8 = vpop.f32.mrf.mxu1 }
 0x101   :  { %v268_v9 = vpop.f32.mrf.mxu0  ;;  %v300_v10 = vpop.f32.mrf.mxu1 }
 0x102   :  { %v269_v13 = vadd.f32 %v388_v28, %v268_v9  ;;  %v301_v14 = vadd.f32 %v388_v28, %v300_v10 }
 0x103   :  { %v270_v15 = vpop.f32.mrf.mxu0  ;;  %v302_v16 = vpop.f32.mrf.mxu1 }
 0x104   :  { %v472_v17 = vpack.c.bf16 %v269_v13, %v266_v11  ;;  %v492_v18 = vpack.c.bf16 %v301_v14, %v298_v12 }
 0x106   :  { %496 = vst [vmem:[%s687_s3 + $0x18] sm:$0xff] %v472_v17   ;;  %500 = vst [vmem:[%s687_s3 + $0x38] sm:$0xff] %v492_v18  }

// kernel: _lambda_.4
= control target key start
LH: loop header
LB: loop body
LE: loop exit
PB: predicated region body
PF: predicated region fallthrough
CT: control target
= control target key end

     0   :  { %vm355_vm0 = vcmask 1043456   ;;  %vm258_vm1 = vcmask 195584   ;;  %s1819_s1 = inlined_call_operand.vmem [shape: bf16[24,128], index: 1, kind: input, shape index: {}]   ;;  %s1820_s0 = inlined_call_operand.vmem [shape: bf16[512,24], index: 0, kind: input, shape index: {}]   ;;  %s1821_s2 = inlined_call_operand.vmem [shape: f32[1,128], index: 2, kind: input, shape index: {}]   ;;  %s1822_s3 = inlined_call_operand.vmem [shape: bf16[512,128], index: 3, kind: output, shape index: {}]  }
   0x1   :  { %v1466_v0 = vld [vmem:[%s1819_s1 + $0x8] ss:$0 sps:$4 sm:$0xff]   ;;  %v1467_v1 = vld [vmem:[%s1819_s1] sm:$0xff]   ;;  %v1472_v7 = vld [vmem:[%s1820_s0 + $0x10] sm:$0xff]  }
   0x2   :  { %1464 = vmatprep.subr.msk.bf16.mxu0 %vm355_vm0, %v1466_v0  ;;  %1465 = vmatprep.subr.msk.bf16.mxu1 %vm355_vm0, %v1466_v0  ;;  %v357_v2 = vsel %vm355_vm0, %v1466_v0, 0  ;;  %v1468_v3 = vld [vmem:[%s1820_s0] sm:$0xff]   ;;  %v1470_v5 = vld [vmem:[%s1820_s0 + $0x8] sm:$0xff]   ;;  %v1473_v8 = vld [vmem:[%s1820_s0 + $0x90] sm:$0xff]  }
   0x3   :  { %1393 = vmatpush3.bf16.msra.mxu0 %v357_v2  ;;  %1462 = vmatpush3.bf16.msra.mxu1 %v357_v2  ;;  %v1469_v4 = vld [vmem:[%s1820_s0 + $0x80] sm:$0xff]   ;;  %v1471_v6 = vld [vmem:[%s1820_s0 + $0x88] sm:$0xff]   ;;  %v1474_v9 = vld [vmem:[%s1820_s0 + $0x18] sm:$0xff]  }
   0x4   :  { %1394 = vmatprep.subr.bf16.mxu0 %v1467_v1  ;;  %1461 = vmatprep.subr.bf16.mxu1 %v1467_v1  ;;  %v1475_v10 = vld [vmem:[%s1820_s0 + $0x98] sm:$0xff]   ;;  %v1476_v11 = vld [vmem:[%s1820_s0 + $0x20] sm:$0xff]   ;;  %v1478_v13 = vld [vmem:[%s1820_s0 + $0x28] sm:$0xff]  }
   0x5   :  { %1396 = vmatprep.mubr.msk.bf16.mxu0 %vm258_vm1, %v1468_v3  ;;  %1428 = vmatprep.mubr.msk.bf16.mxu1 %vm258_vm1, %v1469_v4  ;;  %v1477_v12 = vld [vmem:[%s1820_s0 + $0xa0] sm:$0xff]   ;;  %v1479_v14 = vld [vmem:[%s1820_s0 + $0xa8] sm:$0xff]   ;;  %v1480_v15 = vld [vmem:[%s1820_s0 + $0x30] sm:$0xff]  }
   0x6   :  { %v1481_v16 = vld [vmem:[%s1820_s0 + $0xb0] sm:$0xff]   ;;  %v1482_v17 = vld [vmem:[%s1820_s0 + $0x38] sm:$0xff]   ;;  %v1484_v19 = vld [vmem:[%s1820_s0 + $0x40] sm:$0xff]  }
   0x7   :  { %1395 = vmatpush3.bf16.msra.mxu0 %v1467_v1  ;;  %1463 = vmatpush3.bf16.msra.mxu1 %v1467_v1  ;;  %v1483_v18 = vld [vmem:[%s1820_s0 + $0xb8] sm:$0xff]   ;;  %v1485_v20 = vld [vmem:[%s1820_s0 + $0xc0] sm:$0xff]   ;;  %v1486_v21 = vld [vmem:[%s1820_s0 + $0x48] sm:$0xff]  }
   0x8   :  { %v1487_v22 = vld [vmem:[%s1820_s0 + $0xc8] sm:$0xff]   ;;  %v1488_v23 = vld [vmem:[%s1820_s0 + $0x50] sm:$0xff]   ;;  %v1490_v25 = vld [vmem:[%s1820_s0 + $0x58] sm:$0xff]  }
   0x9   :  { %v1489_v24 = vld [vmem:[%s1820_s0 + $0xd0] sm:$0xff]   ;;  %v1491_v26 = vld [vmem:[%s1820_s0 + $0xd8] sm:$0xff]   ;;  %v1492_v27 = vld [vmem:[%s1820_s0 + $0x60] sm:$0xff]  }
   0xa   :  { %1397 = vmatmul.mubr.msk.bf16.vlgmr.msra.gmra.mxu0 %vm258_vm1, %v1470_v5  ;;  %1429 = vmatmul.mubr.msk.bf16.vlgmr.msra.gmra.mxu1 %vm258_vm1, %v1471_v6  ;;  %v1493_v28 = vld [vmem:[%s1820_s0 + $0xe0] sm:$0xff]   ;;  %v1494_v29 = vld [vmem:[%s1820_s0 + $0x68] sm:$0xff]   ;;  %v1496_v31 = vld [vmem:[%s1820_s0 + $0x70] sm:$0xff]  }
   0xb   :  { %1400 = vmatprep.mubr.msk.bf16.mxu0 %vm258_vm1, %v1472_v7  ;;  %1432 = vmatprep.mubr.msk.bf16.mxu1 %vm258_vm1, %v1473_v8  ;;  %v1495_v30 = vld [vmem:[%s1820_s0 + $0xe8] sm:$0xff]   ;;  %v1497_v32 = vld [vmem:[%s1820_s0 + $0xf0] sm:$0xff]   ;;  %v1498_v33 = vld [vmem:[%s1820_s0 + $0x78] sm:$0xff]  }
   0xc   :  { %v1499_v34 = vld [vmem:[%s1820_s0 + $0xf8] sm:$0xff]   ;;  %v1657_v37 = vld [vmem:[%s1821_s2] ss:$0 sm:$0xff] }
  0x12   :  { %1401 = vmatmul.mubr.msk.bf16.gmra.mxu0 %vm258_vm1, %v1474_v9  ;;  %1433 = vmatmul.mubr.msk.bf16.gmra.mxu1 %vm258_vm1, %v1475_v10 }
  0x13   :  { %1404 = vmatprep.mubr.msk.bf16.mxu0 %vm258_vm1, %v1476_v11  ;;  %1436 = vmatprep.mubr.msk.bf16.mxu1 %vm258_vm1, %v1477_v12 }
  0x1a   :  { %1405 = vmatmul.mubr.msk.bf16.gmra.mxu0 %vm258_vm1, %v1478_v13  ;;  %1437 = vmatmul.mubr.msk.bf16.gmra.mxu1 %vm258_vm1, %v1479_v14 }
  0x1b   :  { %1408 = vmatprep.mubr.msk.bf16.mxu0 %vm258_vm1, %v1480_v15  ;;  %1440 = vmatprep.mubr.msk.bf16.mxu1 %vm258_vm1, %v1481_v16 }
  0x22   :  { %1409 = vmatmul.mubr.msk.bf16.gmra.mxu0 %vm258_vm1, %v1482_v17  ;;  %1441 = vmatmul.mubr.msk.bf16.gmra.mxu1 %vm258_vm1, %v1483_v18 }
  0x23   :  { %1412 = vmatprep.mubr.msk.bf16.mxu0 %vm258_vm1, %v1484_v19  ;;  %1444 = vmatprep.mubr.msk.bf16.mxu1 %vm258_vm1, %v1485_v20 }
  0x2a   :  { %1413 = vmatmul.mubr.msk.bf16.gmra.mxu0 %vm258_vm1, %v1486_v21  ;;  %1445 = vmatmul.mubr.msk.bf16.gmra.mxu1 %vm258_vm1, %v1487_v22 }
  0x2b   :  { %1416 = vmatprep.mubr.msk.bf16.mxu0 %vm258_vm1, %v1488_v23  ;;  %1448 = vmatprep.mubr.msk.bf16.mxu1 %vm258_vm1, %v1489_v24 }
  0x32   :  { %1417 = vmatmul.mubr.msk.bf16.gmra.mxu0 %vm258_vm1, %v1490_v25  ;;  %1449 = vmatmul.mubr.msk.bf16.gmra.mxu1 %vm258_vm1, %v1491_v26 }
  0x33   :  { %1420 = vmatprep.mubr.msk.bf16.mxu0 %vm258_vm1, %v1492_v27  ;;  %1452 = vmatprep.mubr.msk.bf16.mxu1 %vm258_vm1, %v1493_v28 }
  0x3a   :  { %1421 = vmatmul.mubr.msk.bf16.gmra.mxu0 %vm258_vm1, %v1494_v29  ;;  %1453 = vmatmul.mubr.msk.bf16.gmra.mxu1 %vm258_vm1, %v1495_v30 }
  0x3b   :  { %1424 = vmatprep.mubr.msk.bf16.mxu0 %vm258_vm1, %v1496_v31  ;;  %1456 = vmatprep.mubr.msk.bf16.mxu1 %vm258_vm1, %v1497_v32 }
  0x42   :  { %1425 = vmatmul.mubr.msk.bf16.gmra.mxu0 %vm258_vm1, %v1498_v33  ;;  %1457 = vmatmul.mubr.msk.bf16.gmra.mxu1 %vm258_vm1, %v1499_v34 }
  0xca   :  { %v1398_v35 = vpop.f32.mrf.mxu0  ;;  %v1430_v36 = vpop.f32.mrf.mxu1 }
  0xcb   :  { %v402_v42 = vadd.f32 %v1398_v35, %v1657_v37  ;;  %v530_v43 = vadd.f32 %v1430_v36, %v1657_v37 }
  0xcc   :  { %v393_v38 = vpop.f32.mrf.mxu0  ;;  %v521_v39 = vpop.f32.mrf.mxu1 }
  0xcd   :  { %v394_v46 = vadd.f32 %v1657_v37, %v393_v38  ;;  %v522_v47 = vadd.f32 %v1657_v37, %v521_v39 }
  0xce   :  { %v1399_v40 = vpop.f32.mrf.mxu0  ;;  %v1431_v41 = vpop.f32.mrf.mxu1 }
  0xcf   :  { %v405_v44 = vadd.f32 %v1399_v40, %v1657_v37  ;;  %v533_v45 = vadd.f32 %v1431_v41, %v1657_v37 }
  0xd0   :  { %v396_v48 = vpop.f32.mrf.mxu0  ;;  %v524_v49 = vpop.f32.mrf.mxu1 }
  0xd1   :  { %v1175_v50 = vpack.c.bf16 %v405_v44, %v402_v42  ;;  %v1255_v51 = vpack.c.bf16 %v533_v45, %v530_v43  ;;  %v397_v52 = vadd.f32 %v1657_v37, %v396_v48  ;;  %v525_v53 = vadd.f32 %v1657_v37, %v524_v49 }
  0xd2   :  { %v1402_v54 = vpop.f32.mrf.mxu0  ;;  %v1434_v55 = vpop.f32.mrf.mxu1 }
  0xd3   :  { %1327 = vst [vmem:[%s1822_s3 + $0x8] sm:$0xff] %v1175_v50   ;;  %1343 = vst [vmem:[%s1822_s3 + $0x88] sm:$0xff] %v1255_v51   ;;  %v1170_v56 = vpack.c.bf16 %v397_v52, %v394_v46  ;;  %v1250_v57 = vpack.c.bf16 %v525_v53, %v522_v47  ;;  %v418_v62 = vadd.f32 %v1402_v54, %v1657_v37 }
  0xd4   :  { %v409_v58 = vpop.f32.mrf.mxu0  ;;  %v537_v59 = vpop.f32.mrf.mxu1  ;;  %v546_v63 = vadd.f32 %v1434_v55, %v1657_v37 }
  0xd5   :  { %1171 = vst [vmem:[%s1822_s3] sm:$0xff] %v1170_v56   ;;  %1342 = vst [vmem:[%s1822_s3 + $0x80] sm:$0xff] %v1250_v57   ;;  %v410_v2 = vadd.f32 %v1657_v37, %v409_v58  ;;  %v538_v3 = vadd.f32 %v1657_v37, %v537_v59 }
  0xd6   :  { %v1403_v60 = vpop.f32.mrf.mxu0  ;;  %v1435_v61 = vpop.f32.mrf.mxu1 }
  0xd7   :  { %v421_v0 = vadd.f32 %v1403_v60, %v1657_v37  ;;  %v549_v1 = vadd.f32 %v1435_v61, %v1657_v37 }
  0xd8   :  { %v412_v4 = vpop.f32.mrf.mxu0  ;;  %v540_v5 = vpop.f32.mrf.mxu1 }
  0xd9   :  { %v1185_v6 = vpack.c.bf16 %v421_v0, %v418_v62  ;;  %v1265_v7 = vpack.c.bf16 %v549_v1, %v546_v63  ;;  %v413_v8 = vadd.f32 %v1657_v37, %v412_v4  ;;  %v541_v9 = vadd.f32 %v1657_v37, %v540_v5 }
  0xda   :  { %v1406_v10 = vpop.f32.mrf.mxu0  ;;  %v1438_v11 = vpop.f32.mrf.mxu1 }
  0xdb   :  { %1329 = vst [vmem:[%s1822_s3 + $0x18] sm:$0xff] %v1185_v6   ;;  %1345 = vst [vmem:[%s1822_s3 + $0x98] sm:$0xff] %v1265_v7   ;;  %v1180_v12 = vpack.c.bf16 %v413_v8, %v410_v2  ;;  %v1260_v13 = vpack.c.bf16 %v541_v9, %v538_v3  ;;  %v434_v18 = vadd.f32 %v1406_v10, %v1657_v37 }
  0xdc   :  { %v425_v14 = vpop.f32.mrf.mxu0  ;;  %v553_v15 = vpop.f32.mrf.mxu1  ;;  %v562_v19 = vadd.f32 %v1438_v11, %v1657_v37 }
  0xdd   :  { %1328 = vst [vmem:[%s1822_s3 + $0x10] sm:$0xff] %v1180_v12   ;;  %1344 = vst [vmem:[%s1822_s3 + $0x90] sm:$0xff] %v1260_v13   ;;  %v426_v22 = vadd.f32 %v1657_v37, %v425_v14  ;;  %v554_v23 = vadd.f32 %v1657_v37, %v553_v15 }
  0xde   :  { %v1407_v16 = vpop.f32.mrf.mxu0  ;;  %v1439_v17 = vpop.f32.mrf.mxu1 }
  0xdf   :  { %v437_v20 = vadd.f32 %v1407_v16, %v1657_v37  ;;  %v565_v21 = vadd.f32 %v1439_v17, %v1657_v37 }
  0xe0   :  { %v428_v24 = vpop.f32.mrf.mxu0  ;;  %v556_v25 = vpop.f32.mrf.mxu1 }
  0xe1   :  { %v1195_v26 = vpack.c.bf16 %v437_v20, %v434_v18  ;;  %v1275_v27 = vpack.c.bf16 %v565_v21, %v562_v19  ;;  %v429_v28 = vadd.f32 %v1657_v37, %v428_v24  ;;  %v557_v29 = vadd.f32 %v1657_v37, %v556_v25 }
  0xe2   :  { %v1410_v30 = vpop.f32.mrf.mxu0  ;;  %v1442_v31 = vpop.f32.mrf.mxu1 }
  0xe3   :  { %1331 = vst [vmem:[%s1822_s3 + $0x28] sm:$0xff] %v1195_v26   ;;  %1347 = vst [vmem:[%s1822_s3 + $0xa8] sm:$0xff] %v1275_v27   ;;  %v1190_v32 = vpack.c.bf16 %v429_v28, %v426_v22  ;;  %v1270_v33 = vpack.c.bf16 %v557_v29, %v554_v23  ;;  %v450_v39 = vadd.f32 %v1410_v30, %v1657_v37 }
  0xe4   :  { %v441_v34 = vpop.f32.mrf.mxu0  ;;  %v569_v35 = vpop.f32.mrf.mxu1  ;;  %v578_v40 = vadd.f32 %v1442_v31, %v1657_v37 }
  0xe5   :  { %1330 = vst [vmem:[%s1822_s3 + $0x20] sm:$0xff] %v1190_v32   ;;  %1346 = vst [vmem:[%s1822_s3 + $0xa0] sm:$0xff] %v1270_v33   ;;  %v442_v43 = vadd.f32 %v1657_v37, %v441_v34  ;;  %v570_v44 = vadd.f32 %v1657_v37, %v569_v35 }
  0xe6   :  { %v1411_v36 = vpop.f32.mrf.mxu0  ;;  %v1443_v38 = vpop.f32.mrf.mxu1 }
  0xe7   :  { %v453_v41 = vadd.f32 %v1411_v36, %v1657_v37  ;;  %v581_v42 = vadd.f32 %v1443_v38, %v1657_v37 }
  0xe8   :  { %v444_v45 = vpop.f32.mrf.mxu0  ;;  %v572_v46 = vpop.f32.mrf.mxu1 }
  0xe9   :  { %v1205_v47 = vpack.c.bf16 %v453_v41, %v450_v39  ;;  %v1285_v48 = vpack.c.bf16 %v581_v42, %v578_v40  ;;  %v445_v49 = vadd.f32 %v1657_v37, %v444_v45  ;;  %v573_v50 = vadd.f32 %v1657_v37, %v572_v46 }
  0xea   :  { %v1414_v51 = vpop.f32.mrf.mxu0  ;;  %v1446_v52 = vpop.f32.mrf.mxu1 }
  0xeb   :  { %1333 = vst [vmem:[%s1822_s3 + $0x38] sm:$0xff] %v1205_v47   ;;  %1349 = vst [vmem:[%s1822_s3 + $0xb8] sm:$0xff] %v1285_v48   ;;  %v1200_v53 = vpack.c.bf16 %v445_v49, %v442_v43  ;;  %v1280_v54 = vpack.c.bf16 %v573_v50, %v570_v44  ;;  %v466_v59 = vadd.f32 %v1414_v51, %v1657_v37 }
  0xec   :  { %v457_v55 = vpop.f32.mrf.mxu0  ;;  %v585_v56 = vpop.f32.mrf.mxu1  ;;  %v594_v60 = vadd.f32 %v1446_v52, %v1657_v37 }
  0xed   :  { %1332 = vst [vmem:[%s1822_s3 + $0x30] sm:$0xff] %v1200_v53   ;;  %1348 = vst [vmem:[%s1822_s3 + $0xb0] sm:$0xff] %v1280_v54   ;;  %v458_v63 = vadd.f32 %v1657_v37, %v457_v55  ;;  %v586_v0 = vadd.f32 %v1657_v37, %v585_v56 }
  0xee   :  { %v1415_v57 = vpop.f32.mrf.mxu0  ;;  %v1447_v58 = vpop.f32.mrf.mxu1 }
  0xef   :  { %v469_v61 = vadd.f32 %v1415_v57, %v1657_v37  ;;  %v597_v62 = vadd.f32 %v1447_v58, %v1657_v37 }
  0xf0   :  { %v460_v1 = vpop.f32.mrf.mxu0  ;;  %v588_v2 = vpop.f32.mrf.mxu1 }
  0xf1   :  { %v1215_v3 = vpack.c.bf16 %v469_v61, %v466_v59  ;;  %v1295_v4 = vpack.c.bf16 %v597_v62, %v594_v60  ;;  %v461_v5 = vadd.f32 %v1657_v37, %v460_v1  ;;  %v589_v6 = vadd.f32 %v1657_v37, %v588_v2 }
  0xf2   :  { %v1418_v7 = vpop.f32.mrf.mxu0  ;;  %v1450_v8 = vpop.f32.mrf.mxu1 }
  0xf3   :  { %1335 = vst [vmem:[%s1822_s3 + $0x48] sm:$0xff] %v1215_v3   ;;  %1351 = vst [vmem:[%s1822_s3 + $0xc8] sm:$0xff] %v1295_v4   ;;  %v1210_v9 = vpack.c.bf16 %v461_v5, %v458_v63  ;;  %v1290_v10 = vpack.c.bf16 %v589_v6, %v586_v0  ;;  %v482_v15 = vadd.f32 %v1418_v7, %v1657_v37 }
  0xf4   :  { %v473_v11 = vpop.f32.mrf.mxu0  ;;  %v601_v12 = vpop.f32.mrf.mxu1  ;;  %v610_v16 = vadd.f32 %v1450_v8, %v1657_v37 }
  0xf5   :  { %1334 = vst [vmem:[%s1822_s3 + $0x40] sm:$0xff] %v1210_v9   ;;  %1350 = vst [vmem:[%s1822_s3 + $0xc0] sm:$0xff] %v1290_v10   ;;  %v474_v19 = vadd.f32 %v1657_v37, %v473_v11  ;;  %v602_v20 = vadd.f32 %v1657_v37, %v601_v12 }
  0xf6   :  { %v1419_v13 = vpop.f32.mrf.mxu0  ;;  %v1451_v14 = vpop.f32.mrf.mxu1 }
  0xf7   :  { %v485_v17 = vadd.f32 %v1419_v13, %v1657_v37  ;;  %v613_v18 = vadd.f32 %v1451_v14, %v1657_v37 }
  0xf8   :  { %v476_v21 = vpop.f32.mrf.mxu0  ;;  %v604_v22 = vpop.f32.mrf.mxu1 }
  0xf9   :  { %v1225_v23 = vpack.c.bf16 %v485_v17, %v482_v15  ;;  %v1305_v24 = vpack.c.bf16 %v613_v18, %v610_v16  ;;  %v477_v25 = vadd.f32 %v1657_v37, %v476_v21  ;;  %v605_v26 = vadd.f32 %v1657_v37, %v604_v22 }
  0xfa   :  { %v1422_v27 = vpop.f32.mrf.mxu0  ;;  %v1454_v28 = vpop.f32.mrf.mxu1 }
  0xfb   :  { %1337 = vst [vmem:[%s1822_s3 + $0x58] sm:$0xff] %v1225_v23   ;;  %1353 = vst [vmem:[%s1822_s3 + $0xd8] sm:$0xff] %v1305_v24   ;;  %v1220_v29 = vpack.c.bf16 %v477_v25, %v474_v19  ;;  %v1300_v30 = vpack.c.bf16 %v605_v26, %v602_v20  ;;  %v498_v35 = vadd.f32 %v1422_v27, %v1657_v37 }
  0xfc   :  { %v489_v31 = vpop.f32.mrf.mxu0  ;;  %v617_v32 = vpop.f32.mrf.mxu1  ;;  %v626_v36 = vadd.f32 %v1454_v28, %v1657_v37 }
  0xfd   :  { %1336 = vst [vmem:[%s1822_s3 + $0x50] sm:$0xff] %v1220_v29   ;;  %1352 = vst [vmem:[%s1822_s3 + $0xd0] sm:$0xff] %v1300_v30   ;;  %v490_v40 = vadd.f32 %v1657_v37, %v489_v31  ;;  %v618_v41 = vadd.f32 %v1657_v37, %v617_v32 }
  0xfe   :  { %v1423_v33 = vpop.f32.mrf.mxu0  ;;  %v1455_v34 = vpop.f32.mrf.mxu1 }
  0xff   :  { %v501_v38 = vadd.f32 %v1423_v33, %v1657_v37  ;;  %v629_v39 = vadd.f32 %v1455_v34, %v1657_v37 }
 0x100   :  { %v492_v42 = vpop.f32.mrf.mxu0  ;;  %v620_v43 = vpop.f32.mrf.mxu1 }
 0x101   :  { %v1235_v44 = vpack.c.bf16 %v501_v38, %v498_v35  ;;  %v1315_v45 = vpack.c.bf16 %v629_v39, %v626_v36  ;;  %v493_v46 = vadd.f32 %v1657_v37, %v492_v42  ;;  %v621_v47 = vadd.f32 %v1657_v37, %v620_v43 }
 0x102   :  { %v1426_v48 = vpop.f32.mrf.mxu0  ;;  %v1458_v49 = vpop.f32.mrf.mxu1 }
 0x103   :  { %1339 = vst [vmem:[%s1822_s3 + $0x68] sm:$0xff] %v1235_v44   ;;  %1355 = vst [vmem:[%s1822_s3 + $0xe8] sm:$0xff] %v1315_v45   ;;  %v1230_v50 = vpack.c.bf16 %v493_v46, %v490_v40  ;;  %v1310_v51 = vpack.c.bf16 %v621_v47, %v618_v41  ;;  %v514_v56 = vadd.f32 %v1426_v48, %v1657_v37 }
 0x104   :  { %v505_v52 = vpop.f32.mrf.mxu0  ;;  %v633_v53 = vpop.f32.mrf.mxu1  ;;  %v642_v57 = vadd.f32 %v1458_v49, %v1657_v37 }
 0x105   :  { %1338 = vst [vmem:[%s1822_s3 + $0x60] sm:$0xff] %v1230_v50   ;;  %1354 = vst [vmem:[%s1822_s3 + $0xe0] sm:$0xff] %v1310_v51   ;;  %v506_v60 = vadd.f32 %v1657_v37, %v505_v52  ;;  %v634_v61 = vadd.f32 %v1657_v37, %v633_v53 }
 0x106   :  { %v1427_v54 = vpop.f32.mrf.mxu0  ;;  %v1459_v55 = vpop.f32.mrf.mxu1 }
 0x107   :  { %v517_v58 = vadd.f32 %v1427_v54, %v1657_v37  ;;  %v645_v59 = vadd.f32 %v1459_v55, %v1657_v37 }
 0x108   :  { %v508_v62 = vpop.f32.mrf.mxu0  ;;  %v636_v63 = vpop.f32.mrf.mxu1 }
 0x109   :  { %v1245_v0 = vpack.c.bf16 %v517_v58, %v514_v56  ;;  %v1325_v1 = vpack.c.bf16 %v645_v59, %v642_v57  ;;  %v509_v2 = vadd.f32 %v1657_v37, %v508_v62  ;;  %v637_v3 = vadd.f32 %v1657_v37, %v636_v63 }
 0x10b   :  { %1341 = vst [vmem:[%s1822_s3 + $0x78] sm:$0xff] %v1245_v0   ;;  %1357 = vst [vmem:[%s1822_s3 + $0xf8] sm:$0xff] %v1325_v1   ;;  %v1240_v4 = vpack.c.bf16 %v509_v2, %v506_v60  ;;  %v1320_v5 = vpack.c.bf16 %v637_v3, %v634_v61 }
 0x10d   :  { %1340 = vst [vmem:[%s1822_s3 + $0x70] sm:$0xff] %v1240_v4   ;;  %1356 = vst [vmem:[%s1822_s3 + $0xf0] sm:$0xff] %v1320_v5  }

// kernel: _lambda_.5
= control target key start
LH: loop header
LB: loop body
LE: loop exit
PB: predicated region body
PF: predicated region fallthrough
CT: control target
= control target key end

     0   :  { %v1613_v0 = vmov 0   ;;  %vm449_vm0 = vcmask 130048   ;;  %s2246_s1 = inlined_call_operand.vmem [shape: bf16[144,128], index: 1, kind: input, shape index: {}]   ;;  %s2247_s0 = inlined_call_operand.vmem [shape: bf16[512,144], index: 0, kind: input, shape index: {}]   ;;  %s2248_s2 = inlined_call_operand.vmem [shape: f32[1,128], index: 2, kind: input, shape index: {}]   ;;  %s2249_s3 = inlined_call_operand.vmem [shape: bf16[512,128], index: 3, kind: input, shape index: {}]   ;;  %s2250_s4 = inlined_call_operand.vmem [shape: f32[512,128], index: 4, kind: output, shape index: {}]  }
   0x1   :  { %546 = vmatprep.subr.bf16.mxu0 %v1613_v0  ;;  %1488 = vmatprep.subr.bf16.mxu1 %v1613_v0  ;;  %v1507_v1 = vld [vmem:[%s2246_s1 + $0x38] sm:$0xff]   ;;  %v1508_v2 = vld [vmem:[%s2246_s1 + $0x30] sm:$0xff]   ;;  %v1509_v3 = vld [vmem:[%s2246_s1 + $0x28] sm:$0xff]  }
   0x2   :  { %547 = vmatpush1.bf16.msra.mxu0 %v1507_v1  ;;  %1497 = vmatpush1.bf16.msra.mxu1 %v1507_v1  ;;  %v1510_v4 = vld [vmem:[%s2246_s1 + $0x20] sm:$0xff]   ;;  %v1511_v7 = vld [vmem:[%s2246_s1 + $0x18] sm:$0xff]   ;;  %v1512_v8 = vld [vmem:[%s2246_s1 + $0x10] sm:$0xff]  }
   0x3   :  { %548 = vmatprep.subr.bf16.mxu0 %v1613_v0  ;;  %1489 = vmatprep.subr.bf16.mxu1 %v1613_v0  ;;  %v1518_v5 = vld [vmem:[%s2247_s0 + $0x4] ss:$8 sps:$4 sm:$0xff]   ;;  %v1516_v12 = vld [vmem:[%s2247_s0] ss:$8 sps:$4 sm:$0xff]   ;;  %v1522_v14 = vld [vmem:[%s2247_s0 + $0x14] ss:$8 sps:$4 sm:$0xff]  }
   0x4   :  { %v1521_v6 = vld [vmem:[%s2247_s0 + $0x104] ss:$8 sps:$4 sm:$0xff]   ;;  %1297 = vmatprep.mubr.msk.bf16.mxu0 %vm449_vm0, %v1518_v5  ;;  %v1519_v13 = vld [vmem:[%s2247_s0 + $0x100] ss:$8 sps:$4 sm:$0xff]   ;;  %v1524_v15 = vld [vmem:[%s2247_s0 + $0x114] ss:$8 sps:$4 sm:$0xff]  }
   0x5   :  { %1313 = vmatprep.mubr.msk.bf16.mxu1 %vm449_vm0, %v1521_v6  ;;  %v1513_v9 = vld [vmem:[%s2246_s1 + $0x8] sm:$0xff]   ;;  %v1514_v10 = vld [vmem:[%s2246_s1] sm:$0xff]   ;;  %v1526_v16 = vld [vmem:[%s2247_s0 + $0x10] ss:$8 sps:$4 sm:$0xff]  }
   0x6   :  { %549 = vmatpush1.bf16.msra.mxu0 %v1508_v2  ;;  %1498 = vmatpush1.bf16.msra.mxu1 %v1508_v2  ;;  %v1515_v11 = vld [vmem:[%s2246_s1 + $0x40] sm:$0xff]   ;;  %v1527_v17 = vld [vmem:[%s2247_s0 + $0x110] ss:$8 sps:$4 sm:$0xff]   ;;  %v1534_v22 = vld [vmem:[%s2247_s0 + $0x34] ss:$8 sps:$4 sm:$0xff]  }
   0x7   :  { %550 = vmatprep.subr.bf16.mxu0 %v1613_v0  ;;  %1490 = vmatprep.subr.bf16.mxu1 %v1613_v0  ;;  %v1528_v18 = vld [vmem:[%s2247_s0 + $0x24] ss:$8 sps:$4 sm:$0xff]   ;;  %v1532_v20 = vld [vmem:[%s2247_s0 + $0x20] ss:$8 sps:$4 sm:$0xff]   ;;  %v1536_v23 = vld [vmem:[%s2247_s0 + $0x134] ss:$8 sps:$4 sm:$0xff]  }
   0x8   :  { %v1530_v19 = vld [vmem:[%s2247_s0 + $0x124] ss:$8 sps:$4 sm:$0xff]   ;;  %v1533_v21 = vld [vmem:[%s2247_s0 + $0x120] ss:$8 sps:$4 sm:$0xff]   ;;  %v1538_v24 = vld [vmem:[%s2247_s0 + $0x30] ss:$8 sps:$4 sm:$0xff]  }
   0x9   :  { %v1539_v25 = vld [vmem:[%s2247_s0 + $0x130] ss:$8 sps:$4 sm:$0xff]   ;;  %v1540_v26 = vld [vmem:[%s2247_s0 + $0x44] ss:$8 sps:$4 sm:$0xff]   ;;  %v1544_v28 = vld [vmem:[%s2247_s0 + $0x40] ss:$8 sps:$4 sm:$0xff]  }
   0xa   :  { %551 = vmatpush1.bf16.msra.mxu0 %v1509_v3  ;;  %1499 = vmatpush1.bf16.msra.mxu1 %v1509_v3  ;;  %v1542_v27 = vld [vmem:[%s2247_s0 + $0x144] ss:$8 sps:$4 sm:$0xff]   ;;  %v1545_v29 = vld [vmem:[%s2247_s0 + $0x140] ss:$8 sps:$4 sm:$0xff]   ;;  %v1546_v30 = vld [vmem:[%s2247_s0 + $0x54] ss:$8 sps:$4 sm:$0xff]  }
   0xb   :  { %552 = vmatprep.subr.bf16.mxu0 %v1613_v0  ;;  %1491 = vmatprep.subr.bf16.mxu1 %v1613_v0  ;;  %v1548_v31 = vld [vmem:[%s2247_s0 + $0x154] ss:$8 sps:$4 sm:$0xff]   ;;  %v1550_v32 = vld [vmem:[%s2247_s0 + $0x50] ss:$8 sps:$4 sm:$0xff]   ;;  %v1552_v34 = vld [vmem:[%s2247_s0 + $0x64] ss:$8 sps:$4 sm:$0xff]  }
   0xc   :  { %v1551_v33 = vld [vmem:[%s2247_s0 + $0x150] ss:$8 sps:$4 sm:$0xff]   ;;  %v1554_v35 = vld [vmem:[%s2247_s0 + $0x164] ss:$8 sps:$4 sm:$0xff]   ;;  %v1556_v36 = vld [vmem:[%s2247_s0 + $0x60] ss:$8 sps:$4 sm:$0xff]  }
   0xd   :  { %v1557_v37 = vld [vmem:[%s2247_s0 + $0x160] ss:$8 sps:$4 sm:$0xff]   ;;  %v1558_v38 = vld [vmem:[%s2247_s0 + $0x74] ss:$8 sps:$4 sm:$0xff]   ;;  %v1562_v40 = vld [vmem:[%s2247_s0 + $0x70] ss:$8 sps:$4 sm:$0xff]  }
   0xe   :  { %553 = vmatpush1.bf16.msra.mxu0 %v1510_v4  ;;  %1500 = vmatpush1.bf16.msra.mxu1 %v1510_v4  ;;  %v1560_v39 = vld [vmem:[%s2247_s0 + $0x174] ss:$8 sps:$4 sm:$0xff]   ;;  %v1563_v41 = vld [vmem:[%s2247_s0 + $0x170] ss:$8 sps:$4 sm:$0xff]   ;;  %v1564_v42 = vld [vmem:[%s2247_s0 + $0x84] ss:$8 sps:$4 sm:$0xff]  }
   0xf   :  { %554 = vmatprep.subr.bf16.mxu0 %v1613_v0  ;;  %1492 = vmatprep.subr.bf16.mxu1 %v1613_v0  ;;  %v1566_v43 = vld [vmem:[%s2247_s0 + $0x184] ss:$8 sps:$4 sm:$0xff]   ;;  %v1568_v44 = vld [vmem:[%s2247_s0 + $0x80] ss:$8 sps:$4 sm:$0xff]   ;;  %v1570_v46 = vld [vmem:[%s2247_s0 + $0x94] ss:$8 sps:$4 sm:$0xff]  }
  0x10   :  { %v1569_v45 = vld [vmem:[%s2247_s0 + $0x180] ss:$8 sps:$4 sm:$0xff]   ;;  %v1572_v47 = vld [vmem:[%s2247_s0 + $0x194] ss:$8 sps:$4 sm:$0xff]   ;;  %v1574_v48 = vld [vmem:[%s2247_s0 + $0x90] ss:$8 sps:$4 sm:$0xff]  }
  0x11   :  { %v1575_v49 = vld [vmem:[%s2247_s0 + $0x190] ss:$8 sps:$4 sm:$0xff]   ;;  %v1576_v50 = vld [vmem:[%s2247_s0 + $0xa4] ss:$8 sps:$4 sm:$0xff]   ;;  %v1580_v52 = vld [vmem:[%s2247_s0 + $0xa0] ss:$8 sps:$4 sm:$0xff]  }
  0x12   :  { %555 = vmatpush1.bf16.msra.mxu0 %v1511_v7  ;;  %1501 = vmatpush1.bf16.msra.mxu1 %v1511_v7  ;;  %v1578_v51 = vld [vmem:[%s2247_s0 + $0x1a4] ss:$8 sps:$4 sm:$0xff]   ;;  %v1581_v53 = vld [vmem:[%s2247_s0 + $0x1a0] ss:$8 sps:$4 sm:$0xff]   ;;  %v1582_v54 = vld [vmem:[%s2247_s0 + $0xb4] ss:$8 sps:$4 sm:$0xff]  }
  0x13   :  { %556 = vmatprep.subr.bf16.mxu0 %v1613_v0  ;;  %1493 = vmatprep.subr.bf16.mxu1 %v1613_v0  ;;  %v1584_v55 = vld [vmem:[%s2247_s0 + $0x1b4] ss:$8 sps:$4 sm:$0xff]   ;;  %v1586_v56 = vld [vmem:[%s2247_s0 + $0xb0] ss:$8 sps:$4 sm:$0xff]   ;;  %v1588_v58 = vld [vmem:[%s2247_s0 + $0xc4] ss:$8 sps:$4 sm:$0xff]  }
  0x14   :  { %v1587_v57 = vld [vmem:[%s2247_s0 + $0x1b0] ss:$8 sps:$4 sm:$0xff]   ;;  %v1590_v59 = vld [vmem:[%s2247_s0 + $0x1c4] ss:$8 sps:$4 sm:$0xff]   ;;  %v1592_v60 = vld [vmem:[%s2247_s0 + $0xc0] ss:$8 sps:$4 sm:$0xff]  }
  0x15   :  { %v1593_v61 = vld [vmem:[%s2247_s0 + $0x1c0] ss:$8 sps:$4 sm:$0xff]   ;;  %v1594_v62 = vld [vmem:[%s2247_s0 + $0xd4] ss:$8 sps:$4 sm:$0xff]   ;;  %v1599_v1 = vld [vmem:[%s2247_s0 + $0x1d0] ss:$8 sps:$4 sm:$0xff]  }
  0x16   :  { %557 = vmatpush1.bf16.msra.mxu0 %v1512_v8  ;;  %1502 = vmatpush1.bf16.msra.mxu1 %v1512_v8  ;;  %v1596_v63 = vld [vmem:[%s2247_s0 + $0x1d4] ss:$8 sps:$4 sm:$0xff]   ;;  %v1600_v2 = vld [vmem:[%s2247_s0 + $0xe4] ss:$8 sps:$4 sm:$0xff]   ;;  %v1604_v4 = vld [vmem:[%s2247_s0 + $0xe0] ss:$8 sps:$4 sm:$0xff]  }
  0x17   :  { %558 = vmatprep.subr.bf16.mxu0 %v1613_v0  ;;  %1494 = vmatprep.subr.bf16.mxu1 %v1613_v0  ;;  %v1602_v3 = vld [vmem:[%s2247_s0 + $0x1e4] ss:$8 sps:$4 sm:$0xff]   ;;  %v1605_v5 = vld [vmem:[%s2247_s0 + $0x1e0] ss:$8 sps:$4 sm:$0xff]   ;;  %v1606_v6 = vld [vmem:[%s2247_s0 + $0xf4] ss:$8 sps:$4 sm:$0xff]  }
  0x18   :  { %v1608_v7 = vld [vmem:[%s2247_s0 + $0x1f4] ss:$8 sps:$4 sm:$0xff]   ;;  %v1610_v8 = vld [vmem:[%s2247_s0 + $0xf0] ss:$8 sps:$4 sm:$0xff]  }
  0x1a   :  { %559 = vmatpush1.bf16.msra.mxu0 %v1513_v9  ;;  %1503 = vmatpush1.bf16.msra.mxu1 %v1513_v9  ;;  %v1611_v9 = vld [vmem:[%s2247_s0 + $0x1f0] ss:$8 sps:$4 sm:$0xff]  }
  0x1b   :  { %560 = vmatprep.subr.bf16.mxu0 %v1613_v0  ;;  %1495 = vmatprep.subr.bf16.mxu1 %v1613_v0 }
  0x1e   :  { %561 = vmatpush1.bf16.msra.mxu0 %v1514_v10  ;;  %1504 = vmatpush1.bf16.msra.mxu1 %v1514_v10  ;;  %v1893_v10 = vld [vmem:[%s2248_s2] ss:$0 sm:$0xff] }
  0x1f   :  { %576 = vmatprep.subr.bf16.mxu0 %v1613_v0  ;;  %1496 = vmatprep.subr.bf16.mxu1 %v1613_v0  ;;  %v1598_v0 = vld [vmem:[%s2247_s0 + $0xd0] ss:$8 sps:$4 sm:$0xff]  }
  0x22   :  { %577 = vmatpush2.bf16.msra.mxu0 %v1515_v11  ;;  %1505 = vmatpush2.bf16.msra.mxu1 %v1515_v11  ;;  %v1330_v11 = vld [vmem:[%s2249_s3] sm:$0xff]  }
  0x25   :  { %579 = vmatmul.mubr.bf16.vlgmr.msra.gmra.mxu0 %v1516_v12  ;;  %707 = vmatmul.mubr.bf16.vlgmr.msra.gmra.mxu1 %v1519_v13  ;;  %v1472_v12 = vld [vmem:[%s2249_s3 + $0x80] sm:$0xff]  }
  0x26   :  { %1298 = vmatprep.mubr.msk.bf16.mxu0 %vm449_vm0, %v1522_v14  ;;  %1314 = vmatprep.mubr.msk.bf16.mxu1 %vm449_vm0, %v1524_v15 }
  0x2d   :  { %587 = vmatmul.mubr.bf16.gmra.mxu0 %v1526_v16  ;;  %715 = vmatmul.mubr.bf16.gmra.mxu1 %v1527_v17  ;;  %v1331_v16 = vunpack.c.l.bf16 %v1330_v11 }
  0x2e   :  { %1299 = vmatprep.mubr.msk.bf16.mxu0 %vm449_vm0, %v1528_v18  ;;  %1315 = vmatprep.mubr.msk.bf16.mxu1 %vm449_vm0, %v1530_v19  ;;  %v1395_v18 = vunpack.c.l.bf16 %v1472_v12 }
  0x35   :  { %595 = vmatmul.mubr.bf16.gmra.mxu0 %v1532_v20  ;;  %723 = vmatmul.mubr.bf16.gmra.mxu1 %v1533_v21 }
  0x36   :  { %1300 = vmatprep.mubr.msk.bf16.mxu0 %vm449_vm0, %v1534_v22  ;;  %1316 = vmatprep.mubr.msk.bf16.mxu1 %vm449_vm0, %v1536_v23 }
  0x3d   :  { %603 = vmatmul.mubr.bf16.gmra.mxu0 %v1538_v24  ;;  %731 = vmatmul.mubr.bf16.gmra.mxu1 %v1539_v25  ;;  %v1332_v24 = vunpack.c.h.bf16 %v1330_v11 }
  0x3e   :  { %1301 = vmatprep.mubr.msk.bf16.mxu0 %vm449_vm0, %v1540_v26  ;;  %1317 = vmatprep.mubr.msk.bf16.mxu1 %vm449_vm0, %v1542_v27  ;;  %v1396_v26 = vunpack.c.h.bf16 %v1472_v12 }
  0x45   :  { %611 = vmatmul.mubr.bf16.gmra.mxu0 %v1544_v28  ;;  %739 = vmatmul.mubr.bf16.gmra.mxu1 %v1545_v29 }
  0x46   :  { %1302 = vmatprep.mubr.msk.bf16.mxu0 %vm449_vm0, %v1546_v30  ;;  %1318 = vmatprep.mubr.msk.bf16.mxu1 %vm449_vm0, %v1548_v31  ;;  %v1457_v31 = vld [vmem:[%s2249_s3 + $0x8] sm:$0xff]  }
  0x4d   :  { %619 = vmatmul.mubr.bf16.gmra.mxu0 %v1550_v32  ;;  %747 = vmatmul.mubr.bf16.gmra.mxu1 %v1551_v33  ;;  %v1473_v32 = vld [vmem:[%s2249_s3 + $0x88] sm:$0xff]  }
  0x4e   :  { %1303 = vmatprep.mubr.msk.bf16.mxu0 %vm449_vm0, %v1552_v34  ;;  %1319 = vmatprep.mubr.msk.bf16.mxu1 %vm449_vm0, %v1554_v35 }
  0x55   :  { %627 = vmatmul.mubr.bf16.gmra.mxu0 %v1556_v36  ;;  %755 = vmatmul.mubr.bf16.gmra.mxu1 %v1557_v37 }
  0x56   :  { %1304 = vmatprep.mubr.msk.bf16.mxu0 %vm449_vm0, %v1558_v38  ;;  %1320 = vmatprep.mubr.msk.bf16.mxu1 %vm449_vm0, %v1560_v39 }
  0x5d   :  { %635 = vmatmul.mubr.bf16.gmra.mxu0 %v1562_v40  ;;  %763 = vmatmul.mubr.bf16.gmra.mxu1 %v1563_v41  ;;  %v1335_v40 = vunpack.c.l.bf16 %v1457_v31 }
  0x5e   :  { %1305 = vmatprep.mubr.msk.bf16.mxu0 %vm449_vm0, %v1564_v42  ;;  %1321 = vmatprep.mubr.msk.bf16.mxu1 %vm449_vm0, %v1566_v43  ;;  %v1399_v42 = vunpack.c.l.bf16 %v1473_v32 }
  0x65   :  { %643 = vmatmul.mubr.bf16.gmra.mxu0 %v1568_v44  ;;  %771 = vmatmul.mubr.bf16.gmra.mxu1 %v1569_v45 }
  0x66   :  { %1306 = vmatprep.mubr.msk.bf16.mxu0 %vm449_vm0, %v1570_v46  ;;  %1322 = vmatprep.mubr.msk.bf16.mxu1 %vm449_vm0, %v1572_v47 }
  0x6d   :  { %651 = vmatmul.mubr.bf16.gmra.mxu0 %v1574_v48  ;;  %779 = vmatmul.mubr.bf16.gmra.mxu1 %v1575_v49 }
  0x6e   :  { %1307 = vmatprep.mubr.msk.bf16.mxu0 %vm449_vm0, %v1576_v50  ;;  %1323 = vmatprep.mubr.msk.bf16.mxu1 %vm449_vm0, %v1578_v51 }
  0x75   :  { %659 = vmatmul.mubr.bf16.gmra.mxu0 %v1580_v52  ;;  %787 = vmatmul.mubr.bf16.gmra.mxu1 %v1581_v53 }
  0x76   :  { %1308 = vmatprep.mubr.msk.bf16.mxu0 %vm449_vm0, %v1582_v54  ;;  %1324 = vmatprep.mubr.msk.bf16.mxu1 %vm449_vm0, %v1584_v55  ;;  %v1336_v54 = vunpack.c.h.bf16 %v1457_v31 }
  0x7d   :  { %667 = vmatmul.mubr.bf16.gmra.mxu0 %v1586_v56  ;;  %795 = vmatmul.mubr.bf16.gmra.mxu1 %v1587_v57  ;;  %v1400_v56 = vunpack.c.h.bf16 %v1473_v32 }
  0x7e   :  { %1309 = vmatprep.mubr.msk.bf16.mxu0 %vm449_vm0, %v1588_v58  ;;  %1325 = vmatprep.mubr.msk.bf16.mxu1 %vm449_vm0, %v1590_v59 }
  0x85   :  { %675 = vmatmul.mubr.bf16.gmra.mxu0 %v1592_v60  ;;  %803 = vmatmul.mubr.bf16.gmra.mxu1 %v1593_v61  ;;  %v1458_v61 = vld [vmem:[%s2249_s3 + $0x10] sm:$0xff]  }
  0x86   :  { %1310 = vmatprep.mubr.msk.bf16.mxu0 %vm449_vm0, %v1594_v62  ;;  %1326 = vmatprep.mubr.msk.bf16.mxu1 %vm449_vm0, %v1596_v63  ;;  %v1474_v62 = vld [vmem:[%s2249_s3 + $0x90] sm:$0xff]  }
  0x8d   :  { %683 = vmatmul.mubr.bf16.gmra.mxu0 %v1598_v0  ;;  %811 = vmatmul.mubr.bf16.gmra.mxu1 %v1599_v1 }
  0x8e   :  { %1311 = vmatprep.mubr.msk.bf16.mxu0 %vm449_vm0, %v1600_v2  ;;  %1327 = vmatprep.mubr.msk.bf16.mxu1 %vm449_vm0, %v1602_v3 }
  0x95   :  { %691 = vmatmul.mubr.bf16.gmra.mxu0 %v1604_v4  ;;  %819 = vmatmul.mubr.bf16.gmra.mxu1 %v1605_v5 }
  0x96   :  { %1312 = vmatprep.mubr.msk.bf16.mxu0 %vm449_vm0, %v1606_v6  ;;  %1328 = vmatprep.mubr.msk.bf16.mxu1 %vm449_vm0, %v1608_v7  ;;  %v1339_v6 = vunpack.c.l.bf16 %v1458_v61 }
  0x9d   :  { %699 = vmatmul.mubr.bf16.gmra.mxu0 %v1610_v8  ;;  %827 = vmatmul.mubr.bf16.gmra.mxu1 %v1611_v9  ;;  %v1403_v8 = vunpack.c.l.bf16 %v1474_v62 }
  0xe5   :  { %v580_v13 = vpop.f32.mrf.mxu0  ;;  %v708_v14 = vpop.f32.mrf.mxu1 }
  0xe6   :  { %v581_v15 = vadd.f32 %v1893_v10, %v580_v13  ;;  %v709_v17 = vadd.f32 %v1893_v10, %v708_v14 }
  0xe7   :  { %v582_v19 = vpop.f32.mrf.mxu0  ;;  %v710_v20 = vpop.f32.mrf.mxu1 }
  0xe8   :  { %v835_v21 = vmax.f32 %v581_v15, 0.0  ;;  %v867_v22 = vmax.f32 %v709_v17, 0.0 }
  0xe9   :  { %v583_v23 = vpop.f32.mrf.mxu0  ;;  %v711_v25 = vpop.f32.mrf.mxu1 }
  0xea   :  { %v1027_v27 = vadd.f32 %v1331_v16, %v835_v21  ;;  %v1059_v28 = vadd.f32 %v1395_v18, %v867_v22  ;;  %v584_v29 = vadd.f32 %v1893_v10, %v583_v23  ;;  %v712_v30 = vadd.f32 %v1893_v10, %v711_v25 }
  0xeb   :  { %v585_v33 = vpop.f32.mrf.mxu0  ;;  %v713_v34 = vpop.f32.mrf.mxu1  ;;  %v1340_v21 = vunpack.c.h.bf16 %v1458_v61  ;;  %v1404_v23 = vunpack.c.h.bf16 %v1474_v62 }
  0xec   :  { %v1091_v35 = vmax.f32 %v1027_v27, 0.0  ;;  %v1123_v36 = vmax.f32 %v1059_v28, 0.0  ;;  %v836_v37 = vmax.f32 %v584_v29, 0.0  ;;  %v868_v38 = vmax.f32 %v712_v30, 0.0  ;;  %v1459_v28 = vld [vmem:[%s2249_s3 + $0x18] sm:$0xff]  }
  0xed   :  { %v588_v39 = vpop.f32.mrf.mxu0  ;;  %v716_v41 = vpop.f32.mrf.mxu1  ;;  %v1475_v29 = vld [vmem:[%s2249_s3 + $0x98] sm:$0xff]  }
  0xee   :  { %1155 = vst [vmem:[%s2250_s4] sm:$0xff] %v1091_v35  ;;  %1187 = vst [vmem:[%s2250_s4 + $0x100] sm:$0xff] %v1123_v36  ;;  %v1028_v43 = vadd.f32 %v1332_v24, %v836_v37  ;;  %v1060_v44 = vadd.f32 %v1396_v26, %v868_v38  ;;  %v589_v45 = vadd.f32 %v1893_v10, %v588_v39  ;;  %v1343_v37 = vunpack.c.l.bf16 %v1459_v28 }
  0xef   :  { %v717_v46 = vadd.f32 %v1893_v10, %v716_v41  ;;  %v590_v47 = vpop.f32.mrf.mxu0  ;;  %v718_v48 = vpop.f32.mrf.mxu1  ;;  %v1407_v39 = vunpack.c.l.bf16 %v1475_v29 }
  0xf0   :  { %v1092_v49 = vmax.f32 %v1028_v43, 0.0  ;;  %v1124_v50 = vmax.f32 %v1060_v44, 0.0  ;;  %v837_v51 = vmax.f32 %v589_v45, 0.0 }
  0xf1   :  { %v869_v52 = vmax.f32 %v717_v46, 0.0  ;;  %v591_v53 = vpop.f32.mrf.mxu0  ;;  %v719_v55 = vpop.f32.mrf.mxu1 }
  0xf2   :  { %1156 = vst [vmem:[%s2250_s4 + $0x8] sm:$0xff] %v1092_v49  ;;  %1188 = vst [vmem:[%s2250_s4 + $0x108] sm:$0xff] %v1124_v50  ;;  %v1029_v57 = vadd.f32 %v1335_v40, %v837_v51  ;;  %v592_v59 = vadd.f32 %v1893_v10, %v591_v53  ;;  %v720_v60 = vadd.f32 %v1893_v10, %v719_v55  ;;  %v1344_v51 = vunpack.c.h.bf16 %v1459_v28 }
  0xf3   :  { %v1061_v58 = vadd.f32 %v1399_v42, %v869_v52  ;;  %v593_v63 = vpop.f32.mrf.mxu0  ;;  %v721_v0 = vpop.f32.mrf.mxu1  ;;  %v1408_v53 = vunpack.c.h.bf16 %v1475_v29 }
  0xf4   :  { %v1093_v1 = vmax.f32 %v1029_v57, 0.0  ;;  %v838_v3 = vmax.f32 %v592_v59, 0.0  ;;  %v870_v4 = vmax.f32 %v720_v60, 0.0  ;;  %v1476_v59 = vld [vmem:[%s2249_s3 + $0xa0] sm:$0xff]  }
  0xf5   :  { %v1125_v2 = vmax.f32 %v1061_v58, 0.0  ;;  %v596_v5 = vpop.f32.mrf.mxu0  ;;  %v724_v7 = vpop.f32.mrf.mxu1  ;;  %v1460_v58 = vld [vmem:[%s2249_s3 + $0x20] sm:$0xff]  }
  0xf6   :  { %1157 = vst [vmem:[%s2250_s4 + $0x10] sm:$0xff] %v1093_v1  ;;  %v1030_v9 = vadd.f32 %v1336_v54, %v838_v3  ;;  %v1062_v11 = vadd.f32 %v1400_v56, %v870_v4  ;;  %v597_v12 = vadd.f32 %v1893_v10, %v596_v5  ;;  %v725_v13 = vadd.f32 %v1893_v10, %v724_v7 }
  0xf7   :  { %1189 = vst [vmem:[%s2250_s4 + $0x110] sm:$0xff] %v1125_v2  ;;  %v598_v14 = vpop.f32.mrf.mxu0  ;;  %v726_v15 = vpop.f32.mrf.mxu1  ;;  %v1347_v3 = vunpack.c.l.bf16 %v1460_v58  ;;  %v1411_v5 = vunpack.c.l.bf16 %v1476_v59 }
  0xf8   :  { %v1094_v16 = vmax.f32 %v1030_v9, 0.0  ;;  %v1126_v17 = vmax.f32 %v1062_v11, 0.0  ;;  %v839_v18 = vmax.f32 %v597_v12, 0.0  ;;  %v871_v19 = vmax.f32 %v725_v13, 0.0 }
  0xf9   :  { %v599_v20 = vpop.f32.mrf.mxu0  ;;  %v727_v22 = vpop.f32.mrf.mxu1 }
  0xfa   :  { %1158 = vst [vmem:[%s2250_s4 + $0x18] sm:$0xff] %v1094_v16  ;;  %1190 = vst [vmem:[%s2250_s4 + $0x118] sm:$0xff] %v1126_v17  ;;  %v1031_v24 = vadd.f32 %v1339_v6, %v839_v18  ;;  %v1063_v25 = vadd.f32 %v1403_v8, %v871_v19  ;;  %v600_v26 = vadd.f32 %v1893_v10, %v599_v20  ;;  %v1348_v18 = vunpack.c.h.bf16 %v1460_v58 }
  0xfb   :  { %v728_v27 = vadd.f32 %v1893_v10, %v727_v22  ;;  %v601_v30 = vpop.f32.mrf.mxu0  ;;  %v729_v31 = vpop.f32.mrf.mxu1  ;;  %v1412_v20 = vunpack.c.h.bf16 %v1476_v59 }
  0xfc   :  { %v1095_v32 = vmax.f32 %v1031_v24, 0.0  ;;  %v1127_v33 = vmax.f32 %v1063_v25, 0.0  ;;  %v840_v34 = vmax.f32 %v600_v26, 0.0  ;;  %v1461_v25 = vld [vmem:[%s2249_s3 + $0x28] sm:$0xff]  }
  0xfd   :  { %v872_v35 = vmax.f32 %v728_v27, 0.0  ;;  %v604_v36 = vpop.f32.mrf.mxu0  ;;  %v732_v38 = vpop.f32.mrf.mxu1  ;;  %v1477_v26 = vld [vmem:[%s2249_s3 + $0xa8] sm:$0xff]  }
  0xfe   :  { %1159 = vst [vmem:[%s2250_s4 + $0x20] sm:$0xff] %v1095_v32  ;;  %1191 = vst [vmem:[%s2250_s4 + $0x120] sm:$0xff] %v1127_v33  ;;  %v1032_v40 = vadd.f32 %v1340_v21, %v840_v34  ;;  %v605_v42 = vadd.f32 %v1893_v10, %v604_v36  ;;  %v733_v43 = vadd.f32 %v1893_v10, %v732_v38  ;;  %v1351_v34 = vunpack.c.l.bf16 %v1461_v25 }
  0xff   :  { %v1064_v41 = vadd.f32 %v1404_v23, %v872_v35  ;;  %v606_v44 = vpop.f32.mrf.mxu0  ;;  %v734_v45 = vpop.f32.mrf.mxu1  ;;  %v1415_v36 = vunpack.c.l.bf16 %v1477_v26 }
 0x100   :  { %v1096_v46 = vmax.f32 %v1032_v40, 0.0  ;;  %v841_v48 = vmax.f32 %v605_v42, 0.0  ;;  %v873_v49 = vmax.f32 %v733_v43, 0.0 }
 0x101   :  { %v1128_v47 = vmax.f32 %v1064_v41, 0.0  ;;  %v607_v50 = vpop.f32.mrf.mxu0  ;;  %v735_v52 = vpop.f32.mrf.mxu1 }
 0x102   :  { %1160 = vst [vmem:[%s2250_s4 + $0x28] sm:$0xff] %v1096_v46  ;;  %v1033_v54 = vadd.f32 %v1343_v37, %v841_v48  ;;  %v1065_v55 = vadd.f32 %v1407_v39, %v873_v49  ;;  %v608_v56 = vadd.f32 %v1893_v10, %v607_v50  ;;  %v736_v57 = vadd.f32 %v1893_v10, %v735_v52 }
 0x103   :  { %1192 = vst [vmem:[%s2250_s4 + $0x128] sm:$0xff] %v1128_v47  ;;  %v609_v60 = vpop.f32.mrf.mxu0  ;;  %v737_v61 = vpop.f32.mrf.mxu1  ;;  %v1352_v48 = vunpack.c.h.bf16 %v1461_v25  ;;  %v1416_v50 = vunpack.c.h.bf16 %v1477_v26 }
 0x104   :  { %v1097_v62 = vmax.f32 %v1033_v54, 0.0  ;;  %v1129_v63 = vmax.f32 %v1065_v55, 0.0  ;;  %v842_v0 = vmax.f32 %v608_v56, 0.0  ;;  %v874_v1 = vmax.f32 %v736_v57, 0.0  ;;  %v1462_v55 = vld [vmem:[%s2249_s3 + $0x30] sm:$0xff]  }
 0x105   :  { %v612_v2 = vpop.f32.mrf.mxu0  ;;  %v740_v4 = vpop.f32.mrf.mxu1  ;;  %v1478_v56 = vld [vmem:[%s2249_s3 + $0xb0] sm:$0xff]  }
 0x106   :  { %1161 = vst [vmem:[%s2250_s4 + $0x30] sm:$0xff] %v1097_v62  ;;  %1193 = vst [vmem:[%s2250_s4 + $0x130] sm:$0xff] %v1129_v63  ;;  %v1034_v6 = vadd.f32 %v1344_v51, %v842_v0  ;;  %v1066_v7 = vadd.f32 %v1408_v53, %v874_v1  ;;  %v613_v8 = vadd.f32 %v1893_v10, %v612_v2  ;;  %v1355_v0 = vunpack.c.l.bf16 %v1462_v55 }
 0x107   :  { %v741_v9 = vadd.f32 %v1893_v10, %v740_v4  ;;  %v614_v11 = vpop.f32.mrf.mxu0  ;;  %v742_v12 = vpop.f32.mrf.mxu1  ;;  %v1419_v2 = vunpack.c.l.bf16 %v1478_v56 }
 0x108   :  { %v1098_v13 = vmax.f32 %v1034_v6, 0.0  ;;  %v1130_v14 = vmax.f32 %v1066_v7, 0.0  ;;  %v843_v15 = vmax.f32 %v613_v8, 0.0 }
 0x109   :  { %v875_v16 = vmax.f32 %v741_v9, 0.0  ;;  %v615_v17 = vpop.f32.mrf.mxu0  ;;  %v743_v19 = vpop.f32.mrf.mxu1 }
 0x10a   :  { %1162 = vst [vmem:[%s2250_s4 + $0x38] sm:$0xff] %v1098_v13  ;;  %1194 = vst [vmem:[%s2250_s4 + $0x138] sm:$0xff] %v1130_v14  ;;  %v1035_v21 = vadd.f32 %v1347_v3, %v843_v15  ;;  %v616_v23 = vadd.f32 %v1893_v10, %v615_v17  ;;  %v744_v24 = vadd.f32 %v1893_v10, %v743_v19  ;;  %v1356_v15 = vunpack.c.h.bf16 %v1462_v55 }
 0x10b   :  { %v1067_v22 = vadd.f32 %v1411_v5, %v875_v16  ;;  %v617_v27 = vpop.f32.mrf.mxu0  ;;  %v745_v28 = vpop.f32.mrf.mxu1  ;;  %v1420_v17 = vunpack.c.h.bf16 %v1478_v56 }
 0x10c   :  { %v1099_v29 = vmax.f32 %v1035_v21, 0.0  ;;  %v844_v31 = vmax.f32 %v616_v23, 0.0  ;;  %v876_v32 = vmax.f32 %v744_v24, 0.0  ;;  %v1479_v23 = vld [vmem:[%s2249_s3 + $0xb8] sm:$0xff]  }
 0x10d   :  { %v1131_v30 = vmax.f32 %v1067_v22, 0.0  ;;  %v620_v33 = vpop.f32.mrf.mxu0  ;;  %v748_v35 = vpop.f32.mrf.mxu1  ;;  %v1463_v22 = vld [vmem:[%s2249_s3 + $0x38] sm:$0xff]  }
 0x10e   :  { %1163 = vst [vmem:[%s2250_s4 + $0x40] sm:$0xff] %v1099_v29  ;;  %v1036_v37 = vadd.f32 %v1348_v18, %v844_v31  ;;  %v1068_v38 = vadd.f32 %v1412_v20, %v876_v32  ;;  %v621_v39 = vadd.f32 %v1893_v10, %v620_v33  ;;  %v749_v40 = vadd.f32 %v1893_v10, %v748_v35 }
 0x10f   :  { %1195 = vst [vmem:[%s2250_s4 + $0x140] sm:$0xff] %v1131_v30  ;;  %v622_v41 = vpop.f32.mrf.mxu0  ;;  %v750_v42 = vpop.f32.mrf.mxu1  ;;  %v1359_v31 = vunpack.c.l.bf16 %v1463_v22  ;;  %v1423_v33 = vunpack.c.l.bf16 %v1479_v23 }
 0x110   :  { %v1100_v43 = vmax.f32 %v1036_v37, 0.0  ;;  %v1132_v44 = vmax.f32 %v1068_v38, 0.0  ;;  %v845_v45 = vmax.f32 %v621_v39, 0.0  ;;  %v877_v46 = vmax.f32 %v749_v40, 0.0 }
 0x111   :  { %v623_v47 = vpop.f32.mrf.mxu0  ;;  %v751_v49 = vpop.f32.mrf.mxu1 }
 0x112   :  { %1164 = vst [vmem:[%s2250_s4 + $0x48] sm:$0xff] %v1100_v43  ;;  %1196 = vst [vmem:[%s2250_s4 + $0x148] sm:$0xff] %v1132_v44  ;;  %v1037_v51 = vadd.f32 %v1351_v34, %v845_v45  ;;  %v1069_v52 = vadd.f32 %v1415_v36, %v877_v46  ;;  %v624_v53 = vadd.f32 %v1893_v10, %v623_v47  ;;  %v1360_v45 = vunpack.c.h.bf16 %v1463_v22 }
 0x113   :  { %v752_v54 = vadd.f32 %v1893_v10, %v751_v49  ;;  %v625_v57 = vpop.f32.mrf.mxu0  ;;  %v753_v58 = vpop.f32.mrf.mxu1  ;;  %v1424_v47 = vunpack.c.h.bf16 %v1479_v23 }
 0x114   :  { %v1101_v59 = vmax.f32 %v1037_v51, 0.0  ;;  %v1133_v60 = vmax.f32 %v1069_v52, 0.0  ;;  %v846_v61 = vmax.f32 %v624_v53, 0.0  ;;  %v1464_v52 = vld [vmem:[%s2249_s3 + $0x40] sm:$0xff]  }
 0x115   :  { %v878_v62 = vmax.f32 %v752_v54, 0.0  ;;  %v628_v63 = vpop.f32.mrf.mxu0  ;;  %v756_v1 = vpop.f32.mrf.mxu1  ;;  %v1480_v53 = vld [vmem:[%s2249_s3 + $0xc0] sm:$0xff]  }
 0x116   :  { %1165 = vst [vmem:[%s2250_s4 + $0x50] sm:$0xff] %v1101_v59  ;;  %1197 = vst [vmem:[%s2250_s4 + $0x150] sm:$0xff] %v1133_v60  ;;  %v1038_v3 = vadd.f32 %v1352_v48, %v846_v61  ;;  %v629_v5 = vadd.f32 %v1893_v10, %v628_v63  ;;  %v757_v6 = vadd.f32 %v1893_v10, %v756_v1  ;;  %v1363_v61 = vunpack.c.l.bf16 %v1464_v52 }
 0x117   :  { %v1070_v4 = vadd.f32 %v1416_v50, %v878_v62  ;;  %v630_v7 = vpop.f32.mrf.mxu0  ;;  %v758_v8 = vpop.f32.mrf.mxu1  ;;  %v1427_v63 = vunpack.c.l.bf16 %v1480_v53 }
 0x118   :  { %v1102_v9 = vmax.f32 %v1038_v3, 0.0  ;;  %v847_v12 = vmax.f32 %v629_v5, 0.0  ;;  %v879_v13 = vmax.f32 %v757_v6, 0.0 }
 0x119   :  { %v1134_v11 = vmax.f32 %v1070_v4, 0.0  ;;  %v631_v14 = vpop.f32.mrf.mxu0  ;;  %v759_v16 = vpop.f32.mrf.mxu1 }
 0x11a   :  { %1166 = vst [vmem:[%s2250_s4 + $0x58] sm:$0xff] %v1102_v9  ;;  %v1039_v18 = vadd.f32 %v1355_v0, %v847_v12  ;;  %v1071_v19 = vadd.f32 %v1419_v2, %v879_v13  ;;  %v632_v20 = vadd.f32 %v1893_v10, %v631_v14  ;;  %v760_v21 = vadd.f32 %v1893_v10, %v759_v16 }
 0x11b   :  { %1198 = vst [vmem:[%s2250_s4 + $0x158] sm:$0xff] %v1134_v11  ;;  %v633_v24 = vpop.f32.mrf.mxu0  ;;  %v761_v25 = vpop.f32.mrf.mxu1  ;;  %v1364_v12 = vunpack.c.h.bf16 %v1464_v52  ;;  %v1428_v14 = vunpack.c.h.bf16 %v1480_v53 }
 0x11c   :  { %v1103_v26 = vmax.f32 %v1039_v18, 0.0  ;;  %v1135_v27 = vmax.f32 %v1071_v19, 0.0  ;;  %v848_v28 = vmax.f32 %v632_v20, 0.0  ;;  %v880_v29 = vmax.f32 %v760_v21, 0.0  ;;  %v1465_v19 = vld [vmem:[%s2249_s3 + $0x48] sm:$0xff]  }
 0x11d   :  { %v636_v30 = vpop.f32.mrf.mxu0  ;;  %v764_v32 = vpop.f32.mrf.mxu1  ;;  %v1481_v20 = vld [vmem:[%s2249_s3 + $0xc8] sm:$0xff]  }
 0x11e   :  { %1167 = vst [vmem:[%s2250_s4 + $0x60] sm:$0xff] %v1103_v26  ;;  %1199 = vst [vmem:[%s2250_s4 + $0x160] sm:$0xff] %v1135_v27  ;;  %v1040_v34 = vadd.f32 %v1356_v15, %v848_v28  ;;  %v1072_v35 = vadd.f32 %v1420_v17, %v880_v29  ;;  %v637_v36 = vadd.f32 %v1893_v10, %v636_v30  ;;  %v1367_v28 = vunpack.c.l.bf16 %v1465_v19 }
 0x11f   :  { %v765_v37 = vadd.f32 %v1893_v10, %v764_v32  ;;  %v638_v38 = vpop.f32.mrf.mxu0  ;;  %v766_v39 = vpop.f32.mrf.mxu1  ;;  %v1431_v30 = vunpack.c.l.bf16 %v1481_v20 }
 0x120   :  { %v1104_v40 = vmax.f32 %v1040_v34, 0.0  ;;  %v1136_v41 = vmax.f32 %v1072_v35, 0.0  ;;  %v849_v42 = vmax.f32 %v637_v36, 0.0 }
 0x121   :  { %v881_v43 = vmax.f32 %v765_v37, 0.0  ;;  %v639_v44 = vpop.f32.mrf.mxu0  ;;  %v767_v46 = vpop.f32.mrf.mxu1 }
 0x122   :  { %1168 = vst [vmem:[%s2250_s4 + $0x68] sm:$0xff] %v1104_v40  ;;  %1200 = vst [vmem:[%s2250_s4 + $0x168] sm:$0xff] %v1136_v41  ;;  %v1041_v48 = vadd.f32 %v1359_v31, %v849_v42  ;;  %v640_v50 = vadd.f32 %v1893_v10, %v639_v44  ;;  %v768_v51 = vadd.f32 %v1893_v10, %v767_v46  ;;  %v1368_v42 = vunpack.c.h.bf16 %v1465_v19 }
 0x123   :  { %v1073_v49 = vadd.f32 %v1423_v33, %v881_v43  ;;  %v641_v54 = vpop.f32.mrf.mxu0  ;;  %v769_v55 = vpop.f32.mrf.mxu1  ;;  %v1432_v44 = vunpack.c.h.bf16 %v1481_v20 }
 0x124   :  { %v1105_v56 = vmax.f32 %v1041_v48, 0.0  ;;  %v850_v58 = vmax.f32 %v640_v50, 0.0  ;;  %v882_v59 = vmax.f32 %v768_v51, 0.0  ;;  %v1482_v50 = vld [vmem:[%s2249_s3 + $0xd0] sm:$0xff]  }
 0x125   :  { %v1137_v57 = vmax.f32 %v1073_v49, 0.0  ;;  %v644_v60 = vpop.f32.mrf.mxu0  ;;  %v772_v62 = vpop.f32.mrf.mxu1  ;;  %v1466_v49 = vld [vmem:[%s2249_s3 + $0x50] sm:$0xff]  }
 0x126   :  { %1169 = vst [vmem:[%s2250_s4 + $0x70] sm:$0xff] %v1105_v56  ;;  %v1042_v0 = vadd.f32 %v1360_v45, %v850_v58  ;;  %v1074_v1 = vadd.f32 %v1424_v47, %v882_v59  ;;  %v645_v2 = vadd.f32 %v1893_v10, %v644_v60  ;;  %v773_v3 = vadd.f32 %v1893_v10, %v772_v62 }
 0x127   :  { %1201 = vst [vmem:[%s2250_s4 + $0x170] sm:$0xff] %v1137_v57  ;;  %v646_v4 = vpop.f32.mrf.mxu0  ;;  %v774_v5 = vpop.f32.mrf.mxu1  ;;  %v1371_v58 = vunpack.c.l.bf16 %v1466_v49  ;;  %v1435_v60 = vunpack.c.l.bf16 %v1482_v50 }
 0x128   :  { %v1106_v6 = vmax.f32 %v1042_v0, 0.0  ;;  %v1138_v7 = vmax.f32 %v1074_v1, 0.0  ;;  %v851_v8 = vmax.f32 %v645_v2, 0.0  ;;  %v883_v9 = vmax.f32 %v773_v3, 0.0 }
 0x129   :  { %v647_v11 = vpop.f32.mrf.mxu0  ;;  %v775_v13 = vpop.f32.mrf.mxu1 }
 0x12a   :  { %1170 = vst [vmem:[%s2250_s4 + $0x78] sm:$0xff] %v1106_v6  ;;  %1202 = vst [vmem:[%s2250_s4 + $0x178] sm:$0xff] %v1138_v7  ;;  %v1043_v15 = vadd.f32 %v1363_v61, %v851_v8  ;;  %v1075_v16 = vadd.f32 %v1427_v63, %v883_v9  ;;  %v648_v17 = vadd.f32 %v1893_v10, %v647_v11  ;;  %v1372_v8 = vunpack.c.h.bf16 %v1466_v49 }
 0x12b   :  { %v776_v18 = vadd.f32 %v1893_v10, %v775_v13  ;;  %v649_v21 = vpop.f32.mrf.mxu0  ;;  %v777_v22 = vpop.f32.mrf.mxu1  ;;  %v1436_v11 = vunpack.c.h.bf16 %v1482_v50 }
 0x12c   :  { %v1107_v23 = vmax.f32 %v1043_v15, 0.0  ;;  %v1139_v24 = vmax.f32 %v1075_v16, 0.0  ;;  %v852_v25 = vmax.f32 %v648_v17, 0.0  ;;  %v1467_v16 = vld [vmem:[%s2249_s3 + $0x58] sm:$0xff]  }
 0x12d   :  { %v884_v26 = vmax.f32 %v776_v18, 0.0  ;;  %v652_v27 = vpop.f32.mrf.mxu0  ;;  %v780_v29 = vpop.f32.mrf.mxu1  ;;  %v1483_v17 = vld [vmem:[%s2249_s3 + $0xd8] sm:$0xff]  }
 0x12e   :  { %1171 = vst [vmem:[%s2250_s4 + $0x80] sm:$0xff] %v1107_v23  ;;  %1203 = vst [vmem:[%s2250_s4 + $0x180] sm:$0xff] %v1139_v24  ;;  %v1044_v31 = vadd.f32 %v1364_v12, %v852_v25  ;;  %v653_v33 = vadd.f32 %v1893_v10, %v652_v27  ;;  %v781_v34 = vadd.f32 %v1893_v10, %v780_v29  ;;  %v1375_v25 = vunpack.c.l.bf16 %v1467_v16 }
 0x12f   :  { %v1076_v32 = vadd.f32 %v1428_v14, %v884_v26  ;;  %v654_v35 = vpop.f32.mrf.mxu0  ;;  %v782_v36 = vpop.f32.mrf.mxu1  ;;  %v1439_v27 = vunpack.c.l.bf16 %v1483_v17 }
 0x130   :  { %v1108_v37 = vmax.f32 %v1044_v31, 0.0  ;;  %v853_v39 = vmax.f32 %v653_v33, 0.0  ;;  %v885_v40 = vmax.f32 %v781_v34, 0.0 }
 0x131   :  { %v1140_v38 = vmax.f32 %v1076_v32, 0.0  ;;  %v655_v41 = vpop.f32.mrf.mxu0  ;;  %v783_v43 = vpop.f32.mrf.mxu1 }
 0x132   :  { %1172 = vst [vmem:[%s2250_s4 + $0x88] sm:$0xff] %v1108_v37  ;;  %v1045_v45 = vadd.f32 %v1367_v28, %v853_v39  ;;  %v1077_v46 = vadd.f32 %v1431_v30, %v885_v40  ;;  %v656_v47 = vadd.f32 %v1893_v10, %v655_v41  ;;  %v784_v48 = vadd.f32 %v1893_v10, %v783_v43 }
 0x133   :  { %1204 = vst [vmem:[%s2250_s4 + $0x188] sm:$0xff] %v1140_v38  ;;  %v657_v51 = vpop.f32.mrf.mxu0  ;;  %v785_v52 = vpop.f32.mrf.mxu1  ;;  %v1376_v39 = vunpack.c.h.bf16 %v1467_v16  ;;  %v1440_v41 = vunpack.c.h.bf16 %v1483_v17 }
 0x134   :  { %v1109_v53 = vmax.f32 %v1045_v45, 0.0  ;;  %v1141_v54 = vmax.f32 %v1077_v46, 0.0  ;;  %v854_v55 = vmax.f32 %v656_v47, 0.0  ;;  %v886_v56 = vmax.f32 %v784_v48, 0.0  ;;  %v1468_v46 = vld [vmem:[%s2249_s3 + $0x60] sm:$0xff]  }
 0x135   :  { %v660_v57 = vpop.f32.mrf.mxu0  ;;  %v788_v59 = vpop.f32.mrf.mxu1  ;;  %v1484_v47 = vld [vmem:[%s2249_s3 + $0xe0] sm:$0xff]  }
 0x136   :  { %1173 = vst [vmem:[%s2250_s4 + $0x90] sm:$0xff] %v1109_v53  ;;  %1205 = vst [vmem:[%s2250_s4 + $0x190] sm:$0xff] %v1141_v54  ;;  %v1046_v61 = vadd.f32 %v1368_v42, %v854_v55  ;;  %v1078_v62 = vadd.f32 %v1432_v44, %v886_v56  ;;  %v661_v63 = vadd.f32 %v1893_v10, %v660_v57  ;;  %v1379_v55 = vunpack.c.l.bf16 %v1468_v46 }
 0x137   :  { %v789_v0 = vadd.f32 %v1893_v10, %v788_v59  ;;  %v662_v1 = vpop.f32.mrf.mxu0  ;;  %v790_v2 = vpop.f32.mrf.mxu1  ;;  %v1443_v57 = vunpack.c.l.bf16 %v1484_v47 }
 0x138   :  { %v1110_v3 = vmax.f32 %v1046_v61, 0.0  ;;  %v1142_v4 = vmax.f32 %v1078_v62, 0.0  ;;  %v855_v5 = vmax.f32 %v661_v63, 0.0 }
 0x139   :  { %v887_v6 = vmax.f32 %v789_v0, 0.0  ;;  %v663_v7 = vpop.f32.mrf.mxu0  ;;  %v791_v9 = vpop.f32.mrf.mxu1 }
 0x13a   :  { %1174 = vst [vmem:[%s2250_s4 + $0x98] sm:$0xff] %v1110_v3  ;;  %1206 = vst [vmem:[%s2250_s4 + $0x198] sm:$0xff] %v1142_v4  ;;  %v1047_v12 = vadd.f32 %v1371_v58, %v855_v5  ;;  %v664_v14 = vadd.f32 %v1893_v10, %v663_v7  ;;  %v792_v15 = vadd.f32 %v1893_v10, %v791_v9  ;;  %v1380_v5 = vunpack.c.h.bf16 %v1468_v46 }
 0x13b   :  { %v1079_v13 = vadd.f32 %v1435_v60, %v887_v6  ;;  %v665_v18 = vpop.f32.mrf.mxu0  ;;  %v793_v19 = vpop.f32.mrf.mxu1  ;;  %v1444_v7 = vunpack.c.h.bf16 %v1484_v47 }
 0x13c   :  { %v1111_v20 = vmax.f32 %v1047_v12, 0.0  ;;  %v856_v22 = vmax.f32 %v664_v14, 0.0  ;;  %v888_v23 = vmax.f32 %v792_v15, 0.0  ;;  %v1485_v14 = vld [vmem:[%s2249_s3 + $0xe8] sm:$0xff]  }
 0x13d   :  { %v1143_v21 = vmax.f32 %v1079_v13, 0.0  ;;  %v668_v24 = vpop.f32.mrf.mxu0  ;;  %v796_v26 = vpop.f32.mrf.mxu1  ;;  %v1469_v13 = vld [vmem:[%s2249_s3 + $0x68] sm:$0xff]  }
 0x13e   :  { %1175 = vst [vmem:[%s2250_s4 + $0xa0] sm:$0xff] %v1111_v20  ;;  %v1048_v28 = vadd.f32 %v1372_v8, %v856_v22  ;;  %v1080_v29 = vadd.f32 %v1436_v11, %v888_v23  ;;  %v669_v30 = vadd.f32 %v1893_v10, %v668_v24  ;;  %v797_v31 = vadd.f32 %v1893_v10, %v796_v26 }
 0x13f   :  { %1207 = vst [vmem:[%s2250_s4 + $0x1a0] sm:$0xff] %v1143_v21  ;;  %v670_v32 = vpop.f32.mrf.mxu0  ;;  %v798_v33 = vpop.f32.mrf.mxu1  ;;  %v1383_v22 = vunpack.c.l.bf16 %v1469_v13  ;;  %v1447_v24 = vunpack.c.l.bf16 %v1485_v14 }
 0x140   :  { %v1112_v34 = vmax.f32 %v1048_v28, 0.0  ;;  %v1144_v35 = vmax.f32 %v1080_v29, 0.0  ;;  %v857_v36 = vmax.f32 %v669_v30, 0.0  ;;  %v889_v37 = vmax.f32 %v797_v31, 0.0 }
 0x141   :  { %v671_v38 = vpop.f32.mrf.mxu0  ;;  %v799_v40 = vpop.f32.mrf.mxu1 }
 0x142   :  { %1176 = vst [vmem:[%s2250_s4 + $0xa8] sm:$0xff] %v1112_v34  ;;  %1208 = vst [vmem:[%s2250_s4 + $0x1a8] sm:$0xff] %v1144_v35  ;;  %v1049_v42 = vadd.f32 %v1375_v25, %v857_v36  ;;  %v1081_v43 = vadd.f32 %v1439_v27, %v889_v37  ;;  %v672_v44 = vadd.f32 %v1893_v10, %v671_v38  ;;  %v1384_v36 = vunpack.c.h.bf16 %v1469_v13 }
 0x143   :  { %v800_v45 = vadd.f32 %v1893_v10, %v799_v40  ;;  %v673_v48 = vpop.f32.mrf.mxu0  ;;  %v801_v49 = vpop.f32.mrf.mxu1  ;;  %v1448_v38 = vunpack.c.h.bf16 %v1485_v14 }
 0x144   :  { %v1113_v50 = vmax.f32 %v1049_v42, 0.0  ;;  %v1145_v51 = vmax.f32 %v1081_v43, 0.0  ;;  %v858_v52 = vmax.f32 %v672_v44, 0.0  ;;  %v1470_v43 = vld [vmem:[%s2249_s3 + $0x70] sm:$0xff]  }
 0x145   :  { %v890_v53 = vmax.f32 %v800_v45, 0.0  ;;  %v676_v54 = vpop.f32.mrf.mxu0  ;;  %v804_v56 = vpop.f32.mrf.mxu1  ;;  %v1486_v44 = vld [vmem:[%s2249_s3 + $0xf0] sm:$0xff]  }
 0x146   :  { %1177 = vst [vmem:[%s2250_s4 + $0xb0] sm:$0xff] %v1113_v50  ;;  %1209 = vst [vmem:[%s2250_s4 + $0x1b0] sm:$0xff] %v1145_v51  ;;  %v1050_v58 = vadd.f32 %v1376_v39, %v858_v52  ;;  %v677_v60 = vadd.f32 %v1893_v10, %v676_v54  ;;  %v805_v61 = vadd.f32 %v1893_v10, %v804_v56  ;;  %v1387_v52 = vunpack.c.l.bf16 %v1470_v43 }
 0x147   :  { %v1082_v59 = vadd.f32 %v1440_v41, %v890_v53  ;;  %v678_v62 = vpop.f32.mrf.mxu0  ;;  %v806_v63 = vpop.f32.mrf.mxu1  ;;  %v1451_v54 = vunpack.c.l.bf16 %v1486_v44 }
 0x148   :  { %v1114_v0 = vmax.f32 %v1050_v58, 0.0  ;;  %v859_v2 = vmax.f32 %v677_v60, 0.0  ;;  %v891_v3 = vmax.f32 %v805_v61, 0.0 }
 0x149   :  { %v1146_v1 = vmax.f32 %v1082_v59, 0.0  ;;  %v679_v4 = vpop.f32.mrf.mxu0  ;;  %v807_v6 = vpop.f32.mrf.mxu1 }
 0x14a   :  { %1178 = vst [vmem:[%s2250_s4 + $0xb8] sm:$0xff] %v1114_v0  ;;  %v1051_v8 = vadd.f32 %v1379_v55, %v859_v2  ;;  %v1083_v9 = vadd.f32 %v1443_v57, %v891_v3  ;;  %v680_v11 = vadd.f32 %v1893_v10, %v679_v4  ;;  %v808_v12 = vadd.f32 %v1893_v10, %v807_v6 }
 0x14b   :  { %1210 = vst [vmem:[%s2250_s4 + $0x1b8] sm:$0xff] %v1146_v1  ;;  %v681_v15 = vpop.f32.mrf.mxu0  ;;  %v809_v16 = vpop.f32.mrf.mxu1  ;;  %v1388_v2 = vunpack.c.h.bf16 %v1470_v43  ;;  %v1452_v4 = vunpack.c.h.bf16 %v1486_v44 }
 0x14c   :  { %v1115_v17 = vmax.f32 %v1051_v8, 0.0  ;;  %v1147_v18 = vmax.f32 %v1083_v9, 0.0  ;;  %v860_v19 = vmax.f32 %v680_v11, 0.0  ;;  %v892_v20 = vmax.f32 %v808_v12, 0.0  ;;  %v1471_v9 = vld [vmem:[%s2249_s3 + $0x78] sm:$0xff]  }
 0x14d   :  { %v684_v21 = vpop.f32.mrf.mxu0  ;;  %v812_v23 = vpop.f32.mrf.mxu1  ;;  %v1487_v11 = vld [vmem:[%s2249_s3 + $0xf8] sm:$0xff]  }
 0x14e   :  { %1179 = vst [vmem:[%s2250_s4 + $0xc0] sm:$0xff] %v1115_v17  ;;  %1211 = vst [vmem:[%s2250_s4 + $0x1c0] sm:$0xff] %v1147_v18  ;;  %v1052_v25 = vadd.f32 %v1380_v5, %v860_v19  ;;  %v1084_v26 = vadd.f32 %v1444_v7, %v892_v20  ;;  %v685_v27 = vadd.f32 %v1893_v10, %v684_v21  ;;  %v1391_v19 = vunpack.c.l.bf16 %v1471_v9 }
 0x14f   :  { %v813_v28 = vadd.f32 %v1893_v10, %v812_v23  ;;  %v686_v29 = vpop.f32.mrf.mxu0  ;;  %v814_v30 = vpop.f32.mrf.mxu1  ;;  %v1455_v21 = vunpack.c.l.bf16 %v1487_v11  ;;  %v1612_v23 = vld [vmem:[%s2248_s2] ss:$0 sm:$0xff] }
 0x150   :  { %v1116_v31 = vmax.f32 %v1052_v25, 0.0  ;;  %v1148_v32 = vmax.f32 %v1084_v26, 0.0  ;;  %v861_v33 = vmax.f32 %v685_v27, 0.0 }
 0x151   :  { %v893_v34 = vmax.f32 %v813_v28, 0.0  ;;  %v687_v35 = vpop.f32.mrf.mxu0  ;;  %v815_v37 = vpop.f32.mrf.mxu1 }
 0x152   :  { %1180 = vst [vmem:[%s2250_s4 + $0xc8] sm:$0xff] %v1116_v31  ;;  %1212 = vst [vmem:[%s2250_s4 + $0x1c8] sm:$0xff] %v1148_v32  ;;  %v1053_v39 = vadd.f32 %v1383_v22, %v861_v33  ;;  %v688_v41 = vadd.f32 %v1893_v10, %v687_v35  ;;  %v816_v42 = vadd.f32 %v1893_v10, %v815_v37  ;;  %v1392_v33 = vunpack.c.h.bf16 %v1471_v9 }
 0x153   :  { %v1085_v40 = vadd.f32 %v1447_v24, %v893_v34  ;;  %v689_v45 = vpop.f32.mrf.mxu0  ;;  %v817_v46 = vpop.f32.mrf.mxu1  ;;  %v1456_v35 = vunpack.c.h.bf16 %v1487_v11 }
 0x154   :  { %v1117_v47 = vmax.f32 %v1053_v39, 0.0  ;;  %v862_v49 = vmax.f32 %v688_v41, 0.0  ;;  %v894_v50 = vmax.f32 %v816_v42, 0.0 }
 0x155   :  { %v1149_v48 = vmax.f32 %v1085_v40, 0.0  ;;  %v692_v51 = vpop.f32.mrf.mxu0  ;;  %v820_v53 = vpop.f32.mrf.mxu1 }
 0x156   :  { %1181 = vst [vmem:[%s2250_s4 + $0xd0] sm:$0xff] %v1117_v47  ;;  %v1054_v55 = vadd.f32 %v1384_v36, %v862_v49  ;;  %v1086_v56 = vadd.f32 %v1448_v38, %v894_v50  ;;  %v693_v57 = vadd.f32 %v1893_v10, %v692_v51  ;;  %v821_v58 = vadd.f32 %v1893_v10, %v820_v53 }
 0x157   :  { %1213 = vst [vmem:[%s2250_s4 + $0x1d0] sm:$0xff] %v1149_v48  ;;  %v694_v59 = vpop.f32.mrf.mxu0  ;;  %v822_v60 = vpop.f32.mrf.mxu1 }
 0x158   :  { %v1118_v61 = vmax.f32 %v1054_v55, 0.0  ;;  %v1150_v62 = vmax.f32 %v1086_v56, 0.0  ;;  %v863_v63 = vmax.f32 %v693_v57, 0.0  ;;  %v895_v0 = vmax.f32 %v821_v58, 0.0 }
 0x159   :  { %v695_v1 = vpop.f32.mrf.mxu0  ;;  %v823_v3 = vpop.f32.mrf.mxu1 }
 0x15a   :  { %1182 = vst [vmem:[%s2250_s4 + $0xd8] sm:$0xff] %v1118_v61  ;;  %1214 = vst [vmem:[%s2250_s4 + $0x1d8] sm:$0xff] %v1150_v62  ;;  %v1055_v5 = vadd.f32 %v1387_v52, %v863_v63  ;;  %v1087_v6 = vadd.f32 %v1451_v54, %v895_v0  ;;  %v696_v7 = vadd.f32 %v1893_v10, %v695_v1 }
 0x15b   :  { %v824_v8 = vadd.f32 %v1893_v10, %v823_v3  ;;  %v697_v12 = vpop.f32.mrf.mxu0  ;;  %v825_v13 = vpop.f32.mrf.mxu1 }
 0x15c   :  { %v1119_v14 = vmax.f32 %v1055_v5, 0.0  ;;  %v1151_v15 = vmax.f32 %v1087_v6, 0.0  ;;  %v864_v16 = vmax.f32 %v696_v7, 0.0 }
 0x15d   :  { %v896_v17 = vmax.f32 %v824_v8, 0.0  ;;  %v700_v18 = vpop.f32.mrf.mxu0  ;;  %v828_v20 = vpop.f32.mrf.mxu1 }
 0x15e   :  { %1183 = vst [vmem:[%s2250_s4 + $0xe0] sm:$0xff] %v1119_v14  ;;  %1215 = vst [vmem:[%s2250_s4 + $0x1e0] sm:$0xff] %v1151_v15  ;;  %v1056_v10 = vadd.f32 %v1388_v2, %v864_v16  ;;  %v701_v24 = vadd.f32 %v1612_v23, %v700_v18  ;;  %v829_v25 = vadd.f32 %v1612_v23, %v828_v20 }
 0x15f   :  { %v1088_v22 = vadd.f32 %v1452_v4, %v896_v17  ;;  %v702_v26 = vpop.f32.mrf.mxu0  ;;  %v830_v27 = vpop.f32.mrf.mxu1 }
 0x160   :  { %v1120_v28 = vmax.f32 %v1056_v10, 0.0  ;;  %v865_v30 = vmax.f32 %v701_v24, 0.0  ;;  %v897_v31 = vmax.f32 %v829_v25, 0.0 }
 0x161   :  { %v1152_v29 = vmax.f32 %v1088_v22, 0.0  ;;  %v703_v32 = vpop.f32.mrf.mxu0  ;;  %v831_v34 = vpop.f32.mrf.mxu1 }
 0x162   :  { %1184 = vst [vmem:[%s2250_s4 + $0xe8] sm:$0xff] %v1120_v28  ;;  %v1057_v36 = vadd.f32 %v1391_v19, %v865_v30  ;;  %v1089_v37 = vadd.f32 %v1455_v21, %v897_v31  ;;  %v704_v38 = vadd.f32 %v1612_v23, %v703_v32  ;;  %v832_v39 = vadd.f32 %v1612_v23, %v831_v34 }
 0x163   :  { %1216 = vst [vmem:[%s2250_s4 + $0x1e8] sm:$0xff] %v1152_v29  ;;  %v705_v40 = vpop.f32.mrf.mxu0  ;;  %v833_v41 = vpop.f32.mrf.mxu1 }
 0x164   :  { %v1121_v42 = vmax.f32 %v1057_v36, 0.0  ;;  %v1153_v43 = vmax.f32 %v1089_v37, 0.0  ;;  %v866_v44 = vmax.f32 %v704_v38, 0.0  ;;  %v898_v45 = vmax.f32 %v832_v39, 0.0 }
 0x166   :  { %1185 = vst [vmem:[%s2250_s4 + $0xf0] sm:$0xff] %v1121_v42  ;;  %1217 = vst [vmem:[%s2250_s4 + $0x1f0] sm:$0xff] %v1153_v43  ;;  %v1058_v46 = vadd.f32 %v1392_v33, %v866_v44  ;;  %v1090_v47 = vadd.f32 %v1456_v35, %v898_v45 }
 0x168   :  { %v1122_v48 = vmax.f32 %v1058_v46, 0.0  ;;  %v1154_v49 = vmax.f32 %v1090_v47, 0.0 }
 0x16a   :  { %1186 = vst [vmem:[%s2250_s4 + $0xf8] sm:$0xff] %v1122_v48  ;;  %1218 = vst [vmem:[%s2250_s4 + $0x1f8] sm:$0xff] %v1154_v49 }

</bundles_post_ra>
